<compile_context>
chip_gen: v5e
topology: v5e:2x2
jax: 0.10.0
libtpu: 0.0.40
codegen_flags: <defaults>
</compile_context>

<pallas_src>
import numpy as np
import jax
import jax.numpy as jnp
from jax.experimental import pallas as pl
from jax.experimental.pallas import tpu as pltpu

K = 7          # conv kernel size
P = K // 2     # 'same' padding (3)


def _round_up(x, m):
    return (x + m - 1) // m * m


def _make_kernel(H, W, left_pad, total_len):
    HW = H * W

    def kernel(w_ref, mask_ref, x_ref, out_ref, pad_ref):
        # w_ref    : SMEM (2*K*K,) f32            flattened (in_ch, ky, kx) weight
        # mask_ref : VMEM (K, HW) f32             per-dx column-validity masks
        # x_ref    : VMEM (Bt, C, HW)             lane-dense input block
        # out_ref  : VMEM (Bt, 1, HW)             lane-dense output block
        # pad_ref  : VMEM (2, Bt, total_len) f32  zero-padded flattened maps
        Bt, C, _ = x_ref.shape

        # ---- channel mean & max: dense VPU work on (Bt, HW) vregs ----------
        # Stream channel-by-channel: one load per channel feeds both sum & max,
        # keeps only three (Bt, HW) f32 values live.
        x0 = x_ref[:, 0, :].astype(jnp.float32)
        acc_sum = x0
        acc_max = x0
        for c in range(1, C):
            xc = x_ref[:, c, :].astype(jnp.float32)
            acc_sum = acc_sum + xc
            acc_max = jnp.maximum(acc_max, xc)
        avg_map = acc_sum * (1.0 / C)

        # ---- zero only the border strips (interior fully overwritten) ------
        right_len = total_len - (left_pad + HW)
        pad_ref[:, :, 0:left_pad] = jnp.zeros((2, Bt, left_pad), jnp.float32)
        pad_ref[:, :, left_pad + HW:total_len] = jnp.zeros(
            (2, Bt, right_len), jnp.float32)
        pad_ref[0, :, left_pad:left_pad + HW] = avg_map
        pad_ref[1, :, left_pad:left_pad + HW] = acc_max

        # ---- 7x7 conv, 2 in-ch -> 1 out-ch, as lane-offset window FMAs -----
        # Hoist per-dx mask broadcasts out of the 98-tap loop (no CSE of
        # broadcast_in_dim inside loops).
        masks = [jnp.broadcast_to(mask_ref[dx:dx + 1, :], (Bt, HW))
                 for dx in range(K)]

        acc = jnp.zeros((Bt, HW), jnp.float32)
        for dx in range(K):
            part = None
            for c in range(2):
                for dy in range(K):
                    w = w_ref[c * K * K + dy * K + dx]        # scalar from SMEM
                    off = left_pad + (dy - P) * W + (dx - P)   # static offset
                    win = pad_ref[c, :, off:off + HW]          # (Bt, HW)
                    term = w * win
                    part = term if part is None else part + term
            # one masked accumulate per dx (kills row-wrap taps)
            acc = acc + masks[dx] * part

        out_ref[:, 0, :] = jax.nn.sigmoid(acc).astype(out_ref.dtype)

    return kernel


def _pick_block_b(B, C, HW, itemsize, pad_len, budget_bytes=4 << 20):
    """Largest divisor of B whose working set fits the budget, preferring
    block sizes that keep >= 2 grid steps (megacore / v7x)."""
    per_b = max(1, 2 * C * HW * itemsize        # double-buffered input block
                + 2 * pad_len * 4               # padded scratch (2 channels)
                + 2 * HW * itemsize)            # double-buffered output block
    cap = max(1, min(B, budget_bytes // per_b))
    divisors = [d for d in range(1, B + 1) if B % d == 0 and d <= cap]
    multi_step = [d for d in divisors if B // d >= 2]
    return max(multi_step) if multi_step else max(divisors)


def spatial_attention(x, conv_weight):
    """x: (B, C, H, W);  conv_weight: (1, 2, K, K).  Returns (B, 1, H, W)."""
    B, C, H, W = x.shape
    HW = H * W
    pad_f = P * W + P                            # one-sided flat padding length
    left_pad = _round_up(pad_f, 128)             # aligned interior write offset
    total_len = _round_up(left_pad + HW + pad_f, 128)

    # TODO(synk): for very large C, add a trailing "arbitrary" channel-chunk
    # grid axis carrying running (sum, max) in scratch instead of loading the
    # whole channel extent per block.
    itemsize = jnp.dtype(x.dtype).itemsize
    bt = _pick_block_b(B, C, HW, itemsize, total_len)

    w_flat = conv_weight.reshape(-1).astype(jnp.float32)        # (2*K*K,)

    # Per-dx column-validity masks (zero out taps that cross a row edge).
    col = np.arange(HW, dtype=np.int64) % W
    masks = np.stack([((col + dx - P >= 0) & (col + dx - P < W))
                      for dx in range(K)]).astype(np.float32)   # (K, HW)
    masks = jnp.asarray(masks)

    x_flat = x.reshape(B, C, HW)                 # free for contiguous NCHW input

    cost = pl.CostEstimate(
        flops=int(B * HW * (2 * C + 4 * K * K + 2 * K + 4)),
        transcendentals=int(B * HW),
        bytes_accessed=int(x.size * itemsize + B * HW * itemsize
                           + w_flat.size * 4 + masks.size * 4),
    )

    out_flat = pl.pallas_call(
        _make_kernel(H, W, left_pad, total_len),
        out_shape=jax.ShapeDtypeStruct((B, 1, HW), x.dtype),
        grid=(B // bt,),
        in_specs=[
            pl.BlockSpec(memory_space=pltpu.MemorySpace.SMEM),      # weights
            pl.BlockSpec((K, HW), lambda b: (0, 0)),                # masks
            pl.BlockSpec((bt, C, HW), lambda b: (b, 0, 0)),         # x block
        ],
        out_specs=pl.BlockSpec((bt, 1, HW), lambda b: (b, 0, 0)),
        scratch_shapes=[pltpu.VMEM((2, bt, total_len), jnp.float32)],
        compiler_params=pltpu.CompilerParams(
            dimension_semantics=("parallel",),
            vmem_limit_bytes=32 * 1024 * 1024),
        cost_estimate=cost,
    )(w_flat, masks, x_flat)

    return out_flat.reshape(B, 1, H, W)


def _reference(x, conv_weight):
    avg_out = jnp.mean(x, axis=1, keepdims=True)
    max_out = jnp.max(x, axis=1, keepdims=True)
    att = jnp.concatenate([avg_out, max_out], axis=1)
    att = jax.lax.conv_general_dilated(
        att, conv_weight, window_strides=(1, 1),
        padding=((P, P), (P, P)),
        dimension_numbers=("NCHW", "OIHW", "NCHW"))
    return jax.nn.sigmoid(att)


if __name__ == "__main__":
    B, C, H, W = 2, 4, 16, 16

    key = jax.random.PRNGKey(0)
    kx, kw = jax.random.split(key)
    x = jax.random.normal(kx, (B, C, H, W), dtype=jnp.float32)
    # Deterministic conv weight, matches nn.Conv2d(2, 1, 7, bias=False).
    conv_weight = 0.1 * jax.random.normal(kw, (1, 2, K, K), dtype=jnp.float32)

    out = jax.block_until_ready(spatial_attention(x, conv_weight))
    ref = jax.block_until_ready(_reference(x, conv_weight))

    assert out.shape == (B, 1, H, W), out.shape
    assert np.allclose(np.asarray(out), np.asarray(ref), atol=1e-5, rtol=1e-5)

    print("KERNEL_OK")
</pallas_src>

<mosaic_0001>
module attributes {stable_mosaic.version = 11 : i64} {
  func.func @kernel(%arg0: i32, %arg1: memref<98xf32, #tpu.memory_space<smem>>, %arg2: memref<7x256xf32, #tpu.memory_space<vmem>>, %arg3: memref<1x4x256xf32, #tpu.memory_space<vmem>>, %arg4: memref<1x1x256xf32, #tpu.memory_space<vmem>>, %arg5: memref<2x1x512xf32, #tpu.memory_space<vmem>>) attributes {dimension_semantics = [#tpu.dimension_semantics<parallel>], iteration_bounds = array<i64: 2>, scalar_prefetch = 0 : i64, scratch_operands = 1 : i64, tpu.core_type = #tpu.core_type<tc>, window_params = [{transform_indices = @transform_0, window_bounds = array<i64: 98>}, {pipeline_mode = #tpu.pipeline_mode<synchronous>, transform_indices = @transform_1, window_bounds = array<i64: 7, 256>}, {transform_indices = @transform_2, window_bounds = array<i64: 1, 4, 256>}, {transform_indices = @transform_3, window_bounds = array<i64: 1, 1, 256>}]} {
    %c0 = arith.constant 0 : index
    %c0_0 = arith.constant 0 : index
    %c0_1 = arith.constant 0 : index
    %0 = vector.load %arg3[%c0, %c0_0, %c0_1] : memref<1x4x256xf32, #tpu.memory_space<vmem>>, vector<1x1x256xf32>
    %1 = vector.shape_cast %0 : vector<1x1x256xf32> to vector<1x256xf32>
    %c0_2 = arith.constant 0 : index
    %c1 = arith.constant 1 : index
    %c0_3 = arith.constant 0 : index
    %2 = vector.load %arg3[%c0_2, %c1, %c0_3] : memref<1x4x256xf32, #tpu.memory_space<vmem>>, vector<1x1x256xf32>
    %3 = vector.shape_cast %2 : vector<1x1x256xf32> to vector<1x256xf32>
    %4 = arith.addf %1, %3 : vector<1x256xf32>
    %5 = arith.maximumf %1, %3 : vector<1x256xf32>
    %c0_4 = arith.constant 0 : index
    %c2 = arith.constant 2 : index
    %c0_5 = arith.constant 0 : index
    %6 = vector.load %arg3[%c0_4, %c2, %c0_5] : memref<1x4x256xf32, #tpu.memory_space<vmem>>, vector<1x1x256xf32>
    %7 = vector.shape_cast %6 : vector<1x1x256xf32> to vector<1x256xf32>
    %8 = arith.addf %4, %7 : vector<1x256xf32>
    %9 = arith.maximumf %5, %7 : vector<1x256xf32>
    %c0_6 = arith.constant 0 : index
    %c3 = arith.constant 3 : index
    %c0_7 = arith.constant 0 : index
    %10 = vector.load %arg3[%c0_6, %c3, %c0_7] : memref<1x4x256xf32, #tpu.memory_space<vmem>>, vector<1x1x256xf32>
    %11 = vector.shape_cast %10 : vector<1x1x256xf32> to vector<1x256xf32>
    %12 = arith.addf %8, %11 : vector<1x256xf32>
    %13 = arith.maximumf %9, %11 : vector<1x256xf32>
    %cst = arith.constant 2.500000e-01 : f32
    %14 = vector.broadcast %cst : f32 to vector<1x256xf32>
    %15 = arith.mulf %12, %14 : vector<1x256xf32>
    %cst_8 = arith.constant 0.000000e+00 : f32
    %16 = vector.broadcast %cst_8 : f32 to vector<2x1x128xf32>
    %c0_9 = arith.constant 0 : index
    %c0_10 = arith.constant 0 : index
    %c0_11 = arith.constant 0 : index
    %17 = vector.load %arg5[%c0_9, %c0_10, %c0_11] : memref<2x1x512xf32, #tpu.memory_space<vmem>>, vector<2x1x128xf32>
    tpu.vector_store %arg5[%c0_9, %c0_10, %c0_11], %16 {strides = array<i32>} : memref<2x1x512xf32, #tpu.memory_space<vmem>>, vector<2x1x128xf32>,
    %cst_12 = arith.constant 0.000000e+00 : f32
    %18 = vector.broadcast %cst_12 : f32 to vector<2x1x128xf32>
    %c0_13 = arith.constant 0 : index
    %c0_14 = arith.constant 0 : index
    %c384 = arith.constant 384 : index
    %19 = vector.load %arg5[%c0_13, %c0_14, %c384] : memref<2x1x512xf32, #tpu.memory_space<vmem>>, vector<2x1x128xf32>
    tpu.vector_store %arg5[%c0_13, %c0_14, %c384], %18 {strides = array<i32>} : memref<2x1x512xf32, #tpu.memory_space<vmem>>, vector<2x1x128xf32>,
    %c0_15 = arith.constant 0 : index
    %c0_16 = arith.constant 0 : index
    %c128 = arith.constant 128 : index
    %20 = vector.load %arg5[%c0_15, %c0_16, %c128] : memref<2x1x512xf32, #tpu.memory_space<vmem>>, vector<1x1x256xf32>
    %21 = vector.shape_cast %20 : vector<1x1x256xf32> to vector<1x256xf32>
    %22 = vector.shape_cast %15 : vector<1x256xf32> to vector<1x1x256xf32>
    tpu.vector_store %arg5[%c0_15, %c0_16, %c128], %22 {strides = array<i32>} : memref<2x1x512xf32, #tpu.memory_space<vmem>>, vector<1x1x256xf32>,
    %c1_17 = arith.constant 1 : index
    %c0_18 = arith.constant 0 : index
    %c128_19 = arith.constant 128 : index
    %23 = vector.load %arg5[%c1_17, %c0_18, %c128_19] : memref<2x1x512xf32, #tpu.memory_space<vmem>>, vector<1x1x256xf32>
    %24 = vector.shape_cast %23 : vector<1x1x256xf32> to vector<1x256xf32>
    %25 = vector.shape_cast %13 : vector<1x256xf32> to vector<1x1x256xf32>
    tpu.vector_store %arg5[%c1_17, %c0_18, %c128_19], %25 {strides = array<i32>} : memref<2x1x512xf32, #tpu.memory_space<vmem>>, vector<1x1x256xf32>,
    %c0_20 = arith.constant 0 : index
    %c0_21 = arith.constant 0 : index
    %26 = vector.load %arg2[%c0_20, %c0_21] : memref<7x256xf32, #tpu.memory_space<vmem>>, vector<1x256xf32>
    %c1_22 = arith.constant 1 : index
    %c0_23 = arith.constant 0 : index
    %27 = vector.load %arg2[%c1_22, %c0_23] : memref<7x256xf32, #tpu.memory_space<vmem>>, vector<1x256xf32>
    %c2_24 = arith.constant 2 : index
    %c0_25 = arith.constant 0 : index
    %28 = vector.load %arg2[%c2_24, %c0_25] : memref<7x256xf32, #tpu.memory_space<vmem>>, vector<1x256xf32>
    %c3_26 = arith.constant 3 : index
    %c0_27 = arith.constant 0 : index
    %29 = vector.load %arg2[%c3_26, %c0_27] : memref<7x256xf32, #tpu.memory_space<vmem>>, vector<1x256xf32>
    %c4 = arith.constant 4 : index
    %c0_28 = arith.constant 0 : index
    %30 = vector.load %arg2[%c4, %c0_28] : memref<7x256xf32, #tpu.memory_space<vmem>>, vector<1x256xf32>
    %c5 = arith.constant 5 : index
    %c0_29 = arith.constant 0 : index
    %31 = vector.load %arg2[%c5, %c0_29] : memref<7x256xf32, #tpu.memory_space<vmem>>, vector<1x256xf32>
    %c6 = arith.constant 6 : index
    %c0_30 = arith.constant 0 : index
    %32 = vector.load %arg2[%c6, %c0_30] : memref<7x256xf32, #tpu.memory_space<vmem>>, vector<1x256xf32>
    %cst_31 = arith.constant 0.000000e+00 : f32
    %33 = vector.broadcast %cst_31 : f32 to vector<1x256xf32>
    %c0_32 = arith.constant 0 : index
    %34 = memref.load %arg1[%c0_32] : memref<98xf32, #tpu.memory_space<smem>>
    %c0_33 = arith.constant 0 : index
    %c0_34 = arith.constant 0 : index
    %c77 = arith.constant 77 : index
    %35 = vector.load %arg5[%c0_33, %c0_34, %c77] : memref<2x1x512xf32, #tpu.memory_space<vmem>>, vector<1x1x256xf32>
    %36 = vector.shape_cast %35 : vector<1x1x256xf32> to vector<1x256xf32>
    %37 = vector.broadcast %34 : f32 to vector<1x256xf32>
    %38 = arith.mulf %37, %36 : vector<1x256xf32>
    %c7 = arith.constant 7 : index
    %39 = memref.load %arg1[%c7] : memref<98xf32, #tpu.memory_space<smem>>
    %c0_35 = arith.constant 0 : index
    %c0_36 = arith.constant 0 : index
    %c93 = arith.constant 93 : index
    %40 = vector.load %arg5[%c0_35, %c0_36, %c93] : memref<2x1x512xf32, #tpu.memory_space<vmem>>, vector<1x1x256xf32>
    %41 = vector.shape_cast %40 : vector<1x1x256xf32> to vector<1x256xf32>
    %42 = vector.broadcast %39 : f32 to vector<1x256xf32>
    %43 = arith.mulf %42, %41 : vector<1x256xf32>
    %44 = arith.addf %38, %43 : vector<1x256xf32>
    %c14 = arith.constant 14 : index
    %45 = memref.load %arg1[%c14] : memref<98xf32, #tpu.memory_space<smem>>
    %c0_37 = arith.constant 0 : index
    %c0_38 = arith.constant 0 : index
    %c109 = arith.constant 109 : index
    %46 = vector.load %arg5[%c0_37, %c0_38, %c109] : memref<2x1x512xf32, #tpu.memory_space<vmem>>, vector<1x1x256xf32>
    %47 = vector.shape_cast %46 : vector<1x1x256xf32> to vector<1x256xf32>
    %48 = vector.broadcast %45 : f32 to vector<1x256xf32>
    %49 = arith.mulf %48, %47 : vector<1x256xf32>
    %50 = arith.addf %44, %49 : vector<1x256xf32>
    %c21 = arith.constant 21 : index
    %51 = memref.load %arg1[%c21] : memref<98xf32, #tpu.memory_space<smem>>
    %c0_39 = arith.constant 0 : index
    %c0_40 = arith.constant 0 : index
    %c125 = arith.constant 125 : index
    %52 = vector.load %arg5[%c0_39, %c0_40, %c125] : memref<2x1x512xf32, #tpu.memory_space<vmem>>, vector<1x1x256xf32>
    %53 = vector.shape_cast %52 : vector<1x1x256xf32> to vector<1x256xf32>
    %54 = vector.broadcast %51 : f32 to vector<1x256xf32>
    %55 = arith.mulf %54, %53 : vector<1x256xf32>
    %56 = arith.addf %50, %55 : vector<1x256xf32>
    %c28 = arith.constant 28 : index
    %57 = memref.load %arg1[%c28] : memref<98xf32, #tpu.memory_space<smem>>
    %c0_41 = arith.constant 0 : index
    %c0_42 = arith.constant 0 : index
    %c141 = arith.constant 141 : index
    %58 = vector.load %arg5[%c0_41, %c0_42, %c141] : memref<2x1x512xf32, #tpu.memory_space<vmem>>, vector<1x1x256xf32>
    %59 = vector.shape_cast %58 : vector<1x1x256xf32> to vector<1x256xf32>
    %60 = vector.broadcast %57 : f32 to vector<1x256xf32>
    %61 = arith.mulf %60, %59 : vector<1x256xf32>
    %62 = arith.addf %56, %61 : vector<1x256xf32>
    %c35 = arith.constant 35 : index
    %63 = memref.load %arg1[%c35] : memref<98xf32, #tpu.memory_space<smem>>
    %c0_43 = arith.constant 0 : index
    %c0_44 = arith.constant 0 : index
    %c157 = arith.constant 157 : index
    %64 = vector.load %arg5[%c0_43, %c0_44, %c157] : memref<2x1x512xf32, #tpu.memory_space<vmem>>, vector<1x1x256xf32>
    %65 = vector.shape_cast %64 : vector<1x1x256xf32> to vector<1x256xf32>
    %66 = vector.broadcast %63 : f32 to vector<1x256xf32>
    %67 = arith.mulf %66, %65 : vector<1x256xf32>
    %68 = arith.addf %62, %67 : vector<1x256xf32>
    %c42 = arith.constant 42 : index
    %69 = memref.load %arg1[%c42] : memref<98xf32, #tpu.memory_space<smem>>
    %c0_45 = arith.constant 0 : index
    %c0_46 = arith.constant 0 : index
    %c173 = arith.constant 173 : index
    %70 = vector.load %arg5[%c0_45, %c0_46, %c173] : memref<2x1x512xf32, #tpu.memory_space<vmem>>, vector<1x1x256xf32>
    %71 = vector.shape_cast %70 : vector<1x1x256xf32> to vector<1x256xf32>
    %72 = vector.broadcast %69 : f32 to vector<1x256xf32>
    %73 = arith.mulf %72, %71 : vector<1x256xf32>
    %74 = arith.addf %68, %73 : vector<1x256xf32>
    %c49 = arith.constant 49 : index
    %75 = memref.load %arg1[%c49] : memref<98xf32, #tpu.memory_space<smem>>
    %c1_47 = arith.constant 1 : index
    %c0_48 = arith.constant 0 : index
    %c77_49 = arith.constant 77 : index
    %76 = vector.load %arg5[%c1_47, %c0_48, %c77_49] : memref<2x1x512xf32, #tpu.memory_space<vmem>>, vector<1x1x256xf32>
    %77 = vector.shape_cast %76 : vector<1x1x256xf32> to vector<1x256xf32>
    %78 = vector.broadcast %75 : f32 to vector<1x256xf32>
    %79 = arith.mulf %78, %77 : vector<1x256xf32>
    %80 = arith.addf %74, %79 : vector<1x256xf32>
    %c56 = arith.constant 56 : index
    %81 = memref.load %arg1[%c56] : memref<98xf32, #tpu.memory_space<smem>>
    %c1_50 = arith.constant 1 : index
    %c0_51 = arith.constant 0 : index
    %c93_52 = arith.constant 93 : index
    %82 = vector.load %arg5[%c1_50, %c0_51, %c93_52] : memref<2x1x512xf32, #tpu.memory_space<vmem>>, vector<1x1x256xf32>
    %83 = vector.shape_cast %82 : vector<1x1x256xf32> to vector<1x256xf32>
    %84 = vector.broadcast %81 : f32 to vector<1x256xf32>
    %85 = arith.mulf %84, %83 : vector<1x256xf32>
    %86 = arith.addf %80, %85 : vector<1x256xf32>
    %c63 = arith.constant 63 : index
    %87 = memref.load %arg1[%c63] : memref<98xf32, #tpu.memory_space<smem>>
    %c1_53 = arith.constant 1 : index
    %c0_54 = arith.constant 0 : index
    %c109_55 = arith.constant 109 : index
    %88 = vector.load %arg5[%c1_53, %c0_54, %c109_55] : memref<2x1x512xf32, #tpu.memory_space<vmem>>, vector<1x1x256xf32>
    %89 = vector.shape_cast %88 : vector<1x1x256xf32> to vector<1x256xf32>
    %90 = vector.broadcast %87 : f32 to vector<1x256xf32>
    %91 = arith.mulf %90, %89 : vector<1x256xf32>
    %92 = arith.addf %86, %91 : vector<1x256xf32>
    %c70 = arith.constant 70 : index
    %93 = memref.load %arg1[%c70] : memref<98xf32, #tpu.memory_space<smem>>
    %c1_56 = arith.constant 1 : index
    %c0_57 = arith.constant 0 : index
    %c125_58 = arith.constant 125 : index
    %94 = vector.load %arg5[%c1_56, %c0_57, %c125_58] : memref<2x1x512xf32, #tpu.memory_space<vmem>>, vector<1x1x256xf32>
    %95 = vector.shape_cast %94 : vector<1x1x256xf32> to vector<1x256xf32>
    %96 = vector.broadcast %93 : f32 to vector<1x256xf32>
    %97 = arith.mulf %96, %95 : vector<1x256xf32>
    %98 = arith.addf %92, %97 : vector<1x256xf32>
    %c77_59 = arith.constant 77 : index
    %99 = memref.load %arg1[%c77_59] : memref<98xf32, #tpu.memory_space<smem>>
    %c1_60 = arith.constant 1 : index
    %c0_61 = arith.constant 0 : index
    %c141_62 = arith.constant 141 : index
    %100 = vector.load %arg5[%c1_60, %c0_61, %c141_62] : memref<2x1x512xf32, #tpu.memory_space<vmem>>, vector<1x1x256xf32>
    %101 = vector.shape_cast %100 : vector<1x1x256xf32> to vector<1x256xf32>
    %102 = vector.broadcast %99 : f32 to vector<1x256xf32>
    %103 = arith.mulf %102, %101 : vector<1x256xf32>
    %104 = arith.addf %98, %103 : vector<1x256xf32>
    %c84 = arith.constant 84 : index
    %105 = memref.load %arg1[%c84] : memref<98xf32, #tpu.memory_space<smem>>
    %c1_63 = arith.constant 1 : index
    %c0_64 = arith.constant 0 : index
    %c157_65 = arith.constant 157 : index
    %106 = vector.load %arg5[%c1_63, %c0_64, %c157_65] : memref<2x1x512xf32, #tpu.memory_space<vmem>>, vector<1x1x256xf32>
    %107 = vector.shape_cast %106 : vector<1x1x256xf32> to vector<1x256xf32>
    %108 = vector.broadcast %105 : f32 to vector<1x256xf32>
    %109 = arith.mulf %108, %107 : vector<1x256xf32>
    %110 = arith.addf %104, %109 : vector<1x256xf32>
    %c91 = arith.constant 91 : index
    %111 = memref.load %arg1[%c91] : memref<98xf32, #tpu.memory_space<smem>>
    %c1_66 = arith.constant 1 : index
    %c0_67 = arith.constant 0 : index
    %c173_68 = arith.constant 173 : index
    %112 = vector.load %arg5[%c1_66, %c0_67, %c173_68] : memref<2x1x512xf32, #tpu.memory_space<vmem>>, vector<1x1x256xf32>
    %113 = vector.shape_cast %112 : vector<1x1x256xf32> to vector<1x256xf32>
    %114 = vector.broadcast %111 : f32 to vector<1x256xf32>
    %115 = arith.mulf %114, %113 : vector<1x256xf32>
    %116 = arith.addf %110, %115 : vector<1x256xf32>
    %117 = arith.mulf %26, %116 : vector<1x256xf32>
    %118 = arith.addf %33, %117 : vector<1x256xf32>
    %c1_69 = arith.constant 1 : index
    %119 = memref.load %arg1[%c1_69] : memref<98xf32, #tpu.memory_space<smem>>
    %c0_70 = arith.constant 0 : index
    %c0_71 = arith.constant 0 : index
    %c78 = arith.constant 78 : index
    %120 = vector.load %arg5[%c0_70, %c0_71, %c78] : memref<2x1x512xf32, #tpu.memory_space<vmem>>, vector<1x1x256xf32>
    %121 = vector.shape_cast %120 : vector<1x1x256xf32> to vector<1x256xf32>
    %122 = vector.broadcast %119 : f32 to vector<1x256xf32>
    %123 = arith.mulf %122, %121 : vector<1x256xf32>
    %c8 = arith.constant 8 : index
    %124 = memref.load %arg1[%c8] : memref<98xf32, #tpu.memory_space<smem>>
    %c0_72 = arith.constant 0 : index
    %c0_73 = arith.constant 0 : index
    %c94 = arith.constant 94 : index
    %125 = vector.load %arg5[%c0_72, %c0_73, %c94] : memref<2x1x512xf32, #tpu.memory_space<vmem>>, vector<1x1x256xf32>
    %126 = vector.shape_cast %125 : vector<1x1x256xf32> to vector<1x256xf32>
    %127 = vector.broadcast %124 : f32 to vector<1x256xf32>
    %128 = arith.mulf %127, %126 : vector<1x256xf32>
    %129 = arith.addf %123, %128 : vector<1x256xf32>
    %c15 = arith.constant 15 : index
    %130 = memref.load %arg1[%c15] : memref<98xf32, #tpu.memory_space<smem>>
    %c0_74 = arith.constant 0 : index
    %c0_75 = arith.constant 0 : index
    %c110 = arith.constant 110 : index
    %131 = vector.load %arg5[%c0_74, %c0_75, %c110] : memref<2x1x512xf32, #tpu.memory_space<vmem>>, vector<1x1x256xf32>
    %132 = vector.shape_cast %131 : vector<1x1x256xf32> to vector<1x256xf32>
    %133 = vector.broadcast %130 : f32 to vector<1x256xf32>
    %134 = arith.mulf %133, %132 : vector<1x256xf32>
    %135 = arith.addf %129, %134 : vector<1x256xf32>
    %c22 = arith.constant 22 : index
    %136 = memref.load %arg1[%c22] : memref<98xf32, #tpu.memory_space<smem>>
    %c0_76 = arith.constant 0 : index
    %c0_77 = arith.constant 0 : index
    %c126 = arith.constant 126 : index
    %137 = vector.load %arg5[%c0_76, %c0_77, %c126] : memref<2x1x512xf32, #tpu.memory_space<vmem>>, vector<1x1x256xf32>
    %138 = vector.shape_cast %137 : vector<1x1x256xf32> to vector<1x256xf32>
    %139 = vector.broadcast %136 : f32 to vector<1x256xf32>
    %140 = arith.mulf %139, %138 : vector<1x256xf32>
    %141 = arith.addf %135, %140 : vector<1x256xf32>
    %c29 = arith.constant 29 : index
    %142 = memref.load %arg1[%c29] : memref<98xf32, #tpu.memory_space<smem>>
    %c0_78 = arith.constant 0 : index
    %c0_79 = arith.constant 0 : index
    %c142 = arith.constant 142 : index
    %143 = vector.load %arg5[%c0_78, %c0_79, %c142] : memref<2x1x512xf32, #tpu.memory_space<vmem>>, vector<1x1x256xf32>
    %144 = vector.shape_cast %143 : vector<1x1x256xf32> to vector<1x256xf32>
    %145 = vector.broadcast %142 : f32 to vector<1x256xf32>
    %146 = arith.mulf %145, %144 : vector<1x256xf32>
    %147 = arith.addf %141, %146 : vector<1x256xf32>
    %c36 = arith.constant 36 : index
    %148 = memref.load %arg1[%c36] : memref<98xf32, #tpu.memory_space<smem>>
    %c0_80 = arith.constant 0 : index
    %c0_81 = arith.constant 0 : index
    %c158 = arith.constant 158 : index
    %149 = vector.load %arg5[%c0_80, %c0_81, %c158] : memref<2x1x512xf32, #tpu.memory_space<vmem>>, vector<1x1x256xf32>
    %150 = vector.shape_cast %149 : vector<1x1x256xf32> to vector<1x256xf32>
    %151 = vector.broadcast %148 : f32 to vector<1x256xf32>
    %152 = arith.mulf %151, %150 : vector<1x256xf32>
    %153 = arith.addf %147, %152 : vector<1x256xf32>
    %c43 = arith.constant 43 : index
    %154 = memref.load %arg1[%c43] : memref<98xf32, #tpu.memory_space<smem>>
    %c0_82 = arith.constant 0 : index
    %c0_83 = arith.constant 0 : index
    %c174 = arith.constant 174 : index
    %155 = vector.load %arg5[%c0_82, %c0_83, %c174] : memref<2x1x512xf32, #tpu.memory_space<vmem>>, vector<1x1x256xf32>
    %156 = vector.shape_cast %155 : vector<1x1x256xf32> to vector<1x256xf32>
    %157 = vector.broadcast %154 : f32 to vector<1x256xf32>
    %158 = arith.mulf %157, %156 : vector<1x256xf32>
    %159 = arith.addf %153, %158 : vector<1x256xf32>
    %c50 = arith.constant 50 : index
    %160 = memref.load %arg1[%c50] : memref<98xf32, #tpu.memory_space<smem>>
    %c1_84 = arith.constant 1 : index
    %c0_85 = arith.constant 0 : index
    %c78_86 = arith.constant 78 : index
    %161 = vector.load %arg5[%c1_84, %c0_85, %c78_86] : memref<2x1x512xf32, #tpu.memory_space<vmem>>, vector<1x1x256xf32>
    %162 = vector.shape_cast %161 : vector<1x1x256xf32> to vector<1x256xf32>
    %163 = vector.broadcast %160 : f32 to vector<1x256xf32>
    %164 = arith.mulf %163, %162 : vector<1x256xf32>
    %165 = arith.addf %159, %164 : vector<1x256xf32>
    %c57 = arith.constant 57 : index
    %166 = memref.load %arg1[%c57] : memref<98xf32, #tpu.memory_space<smem>>
    %c1_87 = arith.constant 1 : index
    %c0_88 = arith.constant 0 : index
    %c94_89 = arith.constant 94 : index
    %167 = vector.load %arg5[%c1_87, %c0_88, %c94_89] : memref<2x1x512xf32, #tpu.memory_space<vmem>>, vector<1x1x256xf32>
    %168 = vector.shape_cast %167 : vector<1x1x256xf32> to vector<1x256xf32>
    %169 = vector.broadcast %166 : f32 to vector<1x256xf32>
    %170 = arith.mulf %169, %168 : vector<1x256xf32>
    %171 = arith.addf %165, %170 : vector<1x256xf32>
    %c64 = arith.constant 64 : index
    %172 = memref.load %arg1[%c64] : memref<98xf32, #tpu.memory_space<smem>>
    %c1_90 = arith.constant 1 : index
    %c0_91 = arith.constant 0 : index
    %c110_92 = arith.constant 110 : index
    %173 = vector.load %arg5[%c1_90, %c0_91, %c110_92] : memref<2x1x512xf32, #tpu.memory_space<vmem>>, vector<1x1x256xf32>
    %174 = vector.shape_cast %173 : vector<1x1x256xf32> to vector<1x256xf32>
    %175 = vector.broadcast %172 : f32 to vector<1x256xf32>
    %176 = arith.mulf %175, %174 : vector<1x256xf32>
    %177 = arith.addf %171, %176 : vector<1x256xf32>
    %c71 = arith.constant 71 : index
    %178 = memref.load %arg1[%c71] : memref<98xf32, #tpu.memory_space<smem>>
    %c1_93 = arith.constant 1 : index
    %c0_94 = arith.constant 0 : index
    %c126_95 = arith.constant 126 : index
    %179 = vector.load %arg5[%c1_93, %c0_94, %c126_95] : memref<2x1x512xf32, #tpu.memory_space<vmem>>, vector<1x1x256xf32>
    %180 = vector.shape_cast %179 : vector<1x1x256xf32> to vector<1x256xf32>
    %181 = vector.broadcast %178 : f32 to vector<1x256xf32>
    %182 = arith.mulf %181, %180 : vector<1x256xf32>
    %183 = arith.addf %177, %182 : vector<1x256xf32>
    %c78_96 = arith.constant 78 : index
    %184 = memref.load %arg1[%c78_96] : memref<98xf32, #tpu.memory_space<smem>>
    %c1_97 = arith.constant 1 : index
    %c0_98 = arith.constant 0 : index
    %c142_99 = arith.constant 142 : index
    %185 = vector.load %arg5[%c1_97, %c0_98, %c142_99] : memref<2x1x512xf32, #tpu.memory_space<vmem>>, vector<1x1x256xf32>
    %186 = vector.shape_cast %185 : vector<1x1x256xf32> to vector<1x256xf32>
    %187 = vector.broadcast %184 : f32 to vector<1x256xf32>
    %188 = arith.mulf %187, %186 : vector<1x256xf32>
    %189 = arith.addf %183, %188 : vector<1x256xf32>
    %c85 = arith.constant 85 : index
    %190 = memref.load %arg1[%c85] : memref<98xf32, #tpu.memory_space<smem>>
    %c1_100 = arith.constant 1 : index
    %c0_101 = arith.constant 0 : index
    %c158_102 = arith.constant 158 : index
    %191 = vector.load %arg5[%c1_100, %c0_101, %c158_102] : memref<2x1x512xf32, #tpu.memory_space<vmem>>, vector<1x1x256xf32>
    %192 = vector.shape_cast %191 : vector<1x1x256xf32> to vector<1x256xf32>
    %193 = vector.broadcast %190 : f32 to vector<1x256xf32>
    %194 = arith.mulf %193, %192 : vector<1x256xf32>
    %195 = arith.addf %189, %194 : vector<1x256xf32>
    %c92 = arith.constant 92 : index
    %196 = memref.load %arg1[%c92] : memref<98xf32, #tpu.memory_space<smem>>
    %c1_103 = arith.constant 1 : index
    %c0_104 = arith.constant 0 : index
    %c174_105 = arith.constant 174 : index
    %197 = vector.load %arg5[%c1_103, %c0_104, %c174_105] : memref<2x1x512xf32, #tpu.memory_space<vmem>>, vector<1x1x256xf32>
    %198 = vector.shape_cast %197 : vector<1x1x256xf32> to vector<1x256xf32>
    %199 = vector.broadcast %196 : f32 to vector<1x256xf32>
    %200 = arith.mulf %199, %198 : vector<1x256xf32>
    %201 = arith.addf %195, %200 : vector<1x256xf32>
    %202 = arith.mulf %27, %201 : vector<1x256xf32>
    %203 = arith.addf %118, %202 : vector<1x256xf32>
    %c2_106 = arith.constant 2 : index
    %204 = memref.load %arg1[%c2_106] : memref<98xf32, #tpu.memory_space<smem>>
    %c0_107 = arith.constant 0 : index
    %c0_108 = arith.constant 0 : index
    %c79 = arith.constant 79 : index
    %205 = vector.load %arg5[%c0_107, %c0_108, %c79] : memref<2x1x512xf32, #tpu.memory_space<vmem>>, vector<1x1x256xf32>
    %206 = vector.shape_cast %205 : vector<1x1x256xf32> to vector<1x256xf32>
    %207 = vector.broadcast %204 : f32 to vector<1x256xf32>
    %208 = arith.mulf %207, %206 : vector<1x256xf32>
    %c9 = arith.constant 9 : index
    %209 = memref.load %arg1[%c9] : memref<98xf32, #tpu.memory_space<smem>>
    %c0_109 = arith.constant 0 : index
    %c0_110 = arith.constant 0 : index
    %c95 = arith.constant 95 : index
    %210 = vector.load %arg5[%c0_109, %c0_110, %c95] : memref<2x1x512xf32, #tpu.memory_space<vmem>>, vector<1x1x256xf32>
    %211 = vector.shape_cast %210 : vector<1x1x256xf32> to vector<1x256xf32>
    %212 = vector.broadcast %209 : f32 to vector<1x256xf32>
    %213 = arith.mulf %212, %211 : vector<1x256xf32>
    %214 = arith.addf %208, %213 : vector<1x256xf32>
    %c16 = arith.constant 16 : index
    %215 = memref.load %arg1[%c16] : memref<98xf32, #tpu.memory_space<smem>>
    %c0_111 = arith.constant 0 : index
    %c0_112 = arith.constant 0 : index
    %c111 = arith.constant 111 : index
    %216 = vector.load %arg5[%c0_111, %c0_112, %c111] : memref<2x1x512xf32, #tpu.memory_space<vmem>>, vector<1x1x256xf32>
    %217 = vector.shape_cast %216 : vector<1x1x256xf32> to vector<1x256xf32>
    %218 = vector.broadcast %215 : f32 to vector<1x256xf32>
    %219 = arith.mulf %218, %217 : vector<1x256xf32>
    %220 = arith.addf %214, %219 : vector<1x256xf32>
    %c23 = arith.constant 23 : index
    %221 = memref.load %arg1[%c23] : memref<98xf32, #tpu.memory_space<smem>>
    %c0_113 = arith.constant 0 : index
    %c0_114 = arith.constant 0 : index
    %c127 = arith.constant 127 : index
    %222 = vector.load %arg5[%c0_113, %c0_114, %c127] : memref<2x1x512xf32, #tpu.memory_space<vmem>>, vector<1x1x256xf32>
    %223 = vector.shape_cast %222 : vector<1x1x256xf32> to vector<1x256xf32>
    %224 = vector.broadcast %221 : f32 to vector<1x256xf32>
    %225 = arith.mulf %224, %223 : vector<1x256xf32>
    %226 = arith.addf %220, %225 : vector<1x256xf32>
    %c30 = arith.constant 30 : index
    %227 = memref.load %arg1[%c30] : memref<98xf32, #tpu.memory_space<smem>>
    %c0_115 = arith.constant 0 : index
    %c0_116 = arith.constant 0 : index
    %c143 = arith.constant 143 : index
    %228 = vector.load %arg5[%c0_115, %c0_116, %c143] : memref<2x1x512xf32, #tpu.memory_space<vmem>>, vector<1x1x256xf32>
    %229 = vector.shape_cast %228 : vector<1x1x256xf32> to vector<1x256xf32>
    %230 = vector.broadcast %227 : f32 to vector<1x256xf32>
    %231 = arith.mulf %230, %229 : vector<1x256xf32>
    %232 = arith.addf %226, %231 : vector<1x256xf32>
    %c37 = arith.constant 37 : index
    %233 = memref.load %arg1[%c37] : memref<98xf32, #tpu.memory_space<smem>>
    %c0_117 = arith.constant 0 : index
    %c0_118 = arith.constant 0 : index
    %c159 = arith.constant 159 : index
    %234 = vector.load %arg5[%c0_117, %c0_118, %c159] : memref<2x1x512xf32, #tpu.memory_space<vmem>>, vector<1x1x256xf32>
    %235 = vector.shape_cast %234 : vector<1x1x256xf32> to vector<1x256xf32>
    %236 = vector.broadcast %233 : f32 to vector<1x256xf32>
    %237 = arith.mulf %236, %235 : vector<1x256xf32>
    %238 = arith.addf %232, %237 : vector<1x256xf32>
    %c44 = arith.constant 44 : index
    %239 = memref.load %arg1[%c44] : memref<98xf32, #tpu.memory_space<smem>>
    %c0_119 = arith.constant 0 : index
    %c0_120 = arith.constant 0 : index
    %c175 = arith.constant 175 : index
    %240 = vector.load %arg5[%c0_119, %c0_120, %c175] : memref<2x1x512xf32, #tpu.memory_space<vmem>>, vector<1x1x256xf32>
    %241 = vector.shape_cast %240 : vector<1x1x256xf32> to vector<1x256xf32>
    %242 = vector.broadcast %239 : f32 to vector<1x256xf32>
    %243 = arith.mulf %242, %241 : vector<1x256xf32>
    %244 = arith.addf %238, %243 : vector<1x256xf32>
    %c51 = arith.constant 51 : index
    %245 = memref.load %arg1[%c51] : memref<98xf32, #tpu.memory_space<smem>>
    %c1_121 = arith.constant 1 : index
    %c0_122 = arith.constant 0 : index
    %c79_123 = arith.constant 79 : index
    %246 = vector.load %arg5[%c1_121, %c0_122, %c79_123] : memref<2x1x512xf32, #tpu.memory_space<vmem>>, vector<1x1x256xf32>
    %247 = vector.shape_cast %246 : vector<1x1x256xf32> to vector<1x256xf32>
    %248 = vector.broadcast %245 : f32 to vector<1x256xf32>
    %249 = arith.mulf %248, %247 : vector<1x256xf32>
    %250 = arith.addf %244, %249 : vector<1x256xf32>
    %c58 = arith.constant 58 : index
    %251 = memref.load %arg1[%c58] : memref<98xf32, #tpu.memory_space<smem>>
    %c1_124 = arith.constant 1 : index
    %c0_125 = arith.constant 0 : index
    %c95_126 = arith.constant 95 : index
    %252 = vector.load %arg5[%c1_124, %c0_125, %c95_126] : memref<2x1x512xf32, #tpu.memory_space<vmem>>, vector<1x1x256xf32>
    %253 = vector.shape_cast %252 : vector<1x1x256xf32> to vector<1x256xf32>
    %254 = vector.broadcast %251 : f32 to vector<1x256xf32>
    %255 = arith.mulf %254, %253 : vector<1x256xf32>
    %256 = arith.addf %250, %255 : vector<1x256xf32>
    %c65 = arith.constant 65 : index
    %257 = memref.load %arg1[%c65] : memref<98xf32, #tpu.memory_space<smem>>
    %c1_127 = arith.constant 1 : index
    %c0_128 = arith.constant 0 : index
    %c111_129 = arith.constant 111 : index
    %258 = vector.load %arg5[%c1_127, %c0_128, %c111_129] : memref<2x1x512xf32, #tpu.memory_space<vmem>>, vector<1x1x256xf32>
    %259 = vector.shape_cast %258 : vector<1x1x256xf32> to vector<1x256xf32>
    %260 = vector.broadcast %257 : f32 to vector<1x256xf32>
    %261 = arith.mulf %260, %259 : vector<1x256xf32>
    %262 = arith.addf %256, %261 : vector<1x256xf32>
    %c72 = arith.constant 72 : index
    %263 = memref.load %arg1[%c72] : memref<98xf32, #tpu.memory_space<smem>>
    %c1_130 = arith.constant 1 : index
    %c0_131 = arith.constant 0 : index
    %c127_132 = arith.constant 127 : index
    %264 = vector.load %arg5[%c1_130, %c0_131, %c127_132] : memref<2x1x512xf32, #tpu.memory_space<vmem>>, vector<1x1x256xf32>
    %265 = vector.shape_cast %264 : vector<1x1x256xf32> to vector<1x256xf32>
    %266 = vector.broadcast %263 : f32 to vector<1x256xf32>
    %267 = arith.mulf %266, %265 : vector<1x256xf32>
    %268 = arith.addf %262, %267 : vector<1x256xf32>
    %c79_133 = arith.constant 79 : index
    %269 = memref.load %arg1[%c79_133] : memref<98xf32, #tpu.memory_space<smem>>
    %c1_134 = arith.constant 1 : index
    %c0_135 = arith.constant 0 : index
    %c143_136 = arith.constant 143 : index
    %270 = vector.load %arg5[%c1_134, %c0_135, %c143_136] : memref<2x1x512xf32, #tpu.memory_space<vmem>>, vector<1x1x256xf32>
    %271 = vector.shape_cast %270 : vector<1x1x256xf32> to vector<1x256xf32>
    %272 = vector.broadcast %269 : f32 to vector<1x256xf32>
    %273 = arith.mulf %272, %271 : vector<1x256xf32>
    %274 = arith.addf %268, %273 : vector<1x256xf32>
    %c86 = arith.constant 86 : index
    %275 = memref.load %arg1[%c86] : memref<98xf32, #tpu.memory_space<smem>>
    %c1_137 = arith.constant 1 : index
    %c0_138 = arith.constant 0 : index
    %c159_139 = arith.constant 159 : index
    %276 = vector.load %arg5[%c1_137, %c0_138, %c159_139] : memref<2x1x512xf32, #tpu.memory_space<vmem>>, vector<1x1x256xf32>
    %277 = vector.shape_cast %276 : vector<1x1x256xf32> to vector<1x256xf32>
    %278 = vector.broadcast %275 : f32 to vector<1x256xf32>
    %279 = arith.mulf %278, %277 : vector<1x256xf32>
    %280 = arith.addf %274, %279 : vector<1x256xf32>
    %c93_140 = arith.constant 93 : index
    %281 = memref.load %arg1[%c93_140] : memref<98xf32, #tpu.memory_space<smem>>
    %c1_141 = arith.constant 1 : index
    %c0_142 = arith.constant 0 : index
    %c175_143 = arith.constant 175 : index
    %282 = vector.load %arg5[%c1_141, %c0_142, %c175_143] : memref<2x1x512xf32, #tpu.memory_space<vmem>>, vector<1x1x256xf32>
    %283 = vector.shape_cast %282 : vector<1x1x256xf32> to vector<1x256xf32>
    %284 = vector.broadcast %281 : f32 to vector<1x256xf32>
    %285 = arith.mulf %284, %283 : vector<1x256xf32>
    %286 = arith.addf %280, %285 : vector<1x256xf32>
    %287 = arith.mulf %28, %286 : vector<1x256xf32>
    %288 = arith.addf %203, %287 : vector<1x256xf32>
    %c3_144 = arith.constant 3 : index
    %289 = memref.load %arg1[%c3_144] : memref<98xf32, #tpu.memory_space<smem>>
    %c0_145 = arith.constant 0 : index
    %c0_146 = arith.constant 0 : index
    %c80 = arith.constant 80 : index
    %290 = vector.load %arg5[%c0_145, %c0_146, %c80] : memref<2x1x512xf32, #tpu.memory_space<vmem>>, vector<1x1x256xf32>
    %291 = vector.shape_cast %290 : vector<1x1x256xf32> to vector<1x256xf32>
    %292 = vector.broadcast %289 : f32 to vector<1x256xf32>
    %293 = arith.mulf %292, %291 : vector<1x256xf32>
    %c10 = arith.constant 10 : index
    %294 = memref.load %arg1[%c10] : memref<98xf32, #tpu.memory_space<smem>>
    %c0_147 = arith.constant 0 : index
    %c0_148 = arith.constant 0 : index
    %c96 = arith.constant 96 : index
    %295 = vector.load %arg5[%c0_147, %c0_148, %c96] : memref<2x1x512xf32, #tpu.memory_space<vmem>>, vector<1x1x256xf32>
    %296 = vector.shape_cast %295 : vector<1x1x256xf32> to vector<1x256xf32>
    %297 = vector.broadcast %294 : f32 to vector<1x256xf32>
    %298 = arith.mulf %297, %296 : vector<1x256xf32>
    %299 = arith.addf %293, %298 : vector<1x256xf32>
    %c17 = arith.constant 17 : index
    %300 = memref.load %arg1[%c17] : memref<98xf32, #tpu.memory_space<smem>>
    %c0_149 = arith.constant 0 : index
    %c0_150 = arith.constant 0 : index
    %c112 = arith.constant 112 : index
    %301 = vector.load %arg5[%c0_149, %c0_150, %c112] : memref<2x1x512xf32, #tpu.memory_space<vmem>>, vector<1x1x256xf32>
    %302 = vector.shape_cast %301 : vector<1x1x256xf32> to vector<1x256xf32>
    %303 = vector.broadcast %300 : f32 to vector<1x256xf32>
    %304 = arith.mulf %303, %302 : vector<1x256xf32>
    %305 = arith.addf %299, %304 : vector<1x256xf32>
    %c24 = arith.constant 24 : index
    %306 = memref.load %arg1[%c24] : memref<98xf32, #tpu.memory_space<smem>>
    %c0_151 = arith.constant 0 : index
    %c0_152 = arith.constant 0 : index
    %c128_153 = arith.constant 128 : index
    %307 = vector.load %arg5[%c0_151, %c0_152, %c128_153] : memref<2x1x512xf32, #tpu.memory_space<vmem>>, vector<1x1x256xf32>
    %308 = vector.shape_cast %307 : vector<1x1x256xf32> to vector<1x256xf32>
    %309 = vector.broadcast %306 : f32 to vector<1x256xf32>
    %310 = arith.mulf %309, %308 : vector<1x256xf32>
    %311 = arith.addf %305, %310 : vector<1x256xf32>
    %c31 = arith.constant 31 : index
    %312 = memref.load %arg1[%c31] : memref<98xf32, #tpu.memory_space<smem>>
    %c0_154 = arith.constant 0 : index
    %c0_155 = arith.constant 0 : index
    %c144 = arith.constant 144 : index
    %313 = vector.load %arg5[%c0_154, %c0_155, %c144] : memref<2x1x512xf32, #tpu.memory_space<vmem>>, vector<1x1x256xf32>
    %314 = vector.shape_cast %313 : vector<1x1x256xf32> to vector<1x256xf32>
    %315 = vector.broadcast %312 : f32 to vector<1x256xf32>
    %316 = arith.mulf %315, %314 : vector<1x256xf32>
    %317 = arith.addf %311, %316 : vector<1x256xf32>
    %c38 = arith.constant 38 : index
    %318 = memref.load %arg1[%c38] : memref<98xf32, #tpu.memory_space<smem>>
    %c0_156 = arith.constant 0 : index
    %c0_157 = arith.constant 0 : index
    %c160 = arith.constant 160 : index
    %319 = vector.load %arg5[%c0_156, %c0_157, %c160] : memref<2x1x512xf32, #tpu.memory_space<vmem>>, vector<1x1x256xf32>
    %320 = vector.shape_cast %319 : vector<1x1x256xf32> to vector<1x256xf32>
    %321 = vector.broadcast %318 : f32 to vector<1x256xf32>
    %322 = arith.mulf %321, %320 : vector<1x256xf32>
    %323 = arith.addf %317, %322 : vector<1x256xf32>
    %c45 = arith.constant 45 : index
    %324 = memref.load %arg1[%c45] : memref<98xf32, #tpu.memory_space<smem>>
    %c0_158 = arith.constant 0 : index
    %c0_159 = arith.constant 0 : index
    %c176 = arith.constant 176 : index
    %325 = vector.load %arg5[%c0_158, %c0_159, %c176] : memref<2x1x512xf32, #tpu.memory_space<vmem>>, vector<1x1x256xf32>
    %326 = vector.shape_cast %325 : vector<1x1x256xf32> to vector<1x256xf32>
    %327 = vector.broadcast %324 : f32 to vector<1x256xf32>
    %328 = arith.mulf %327, %326 : vector<1x256xf32>
    %329 = arith.addf %323, %328 : vector<1x256xf32>
    %c52 = arith.constant 52 : index
    %330 = memref.load %arg1[%c52] : memref<98xf32, #tpu.memory_space<smem>>
    %c1_160 = arith.constant 1 : index
    %c0_161 = arith.constant 0 : index
    %c80_162 = arith.constant 80 : index
    %331 = vector.load %arg5[%c1_160, %c0_161, %c80_162] : memref<2x1x512xf32, #tpu.memory_space<vmem>>, vector<1x1x256xf32>
    %332 = vector.shape_cast %331 : vector<1x1x256xf32> to vector<1x256xf32>
    %333 = vector.broadcast %330 : f32 to vector<1x256xf32>
    %334 = arith.mulf %333, %332 : vector<1x256xf32>
    %335 = arith.addf %329, %334 : vector<1x256xf32>
    %c59 = arith.constant 59 : index
    %336 = memref.load %arg1[%c59] : memref<98xf32, #tpu.memory_space<smem>>
    %c1_163 = arith.constant 1 : index
    %c0_164 = arith.constant 0 : index
    %c96_165 = arith.constant 96 : index
    %337 = vector.load %arg5[%c1_163, %c0_164, %c96_165] : memref<2x1x512xf32, #tpu.memory_space<vmem>>, vector<1x1x256xf32>
    %338 = vector.shape_cast %337 : vector<1x1x256xf32> to vector<1x256xf32>
    %339 = vector.broadcast %336 : f32 to vector<1x256xf32>
    %340 = arith.mulf %339, %338 : vector<1x256xf32>
    %341 = arith.addf %335, %340 : vector<1x256xf32>
    %c66 = arith.constant 66 : index
    %342 = memref.load %arg1[%c66] : memref<98xf32, #tpu.memory_space<smem>>
    %c1_166 = arith.constant 1 : index
    %c0_167 = arith.constant 0 : index
    %c112_168 = arith.constant 112 : index
    %343 = vector.load %arg5[%c1_166, %c0_167, %c112_168] : memref<2x1x512xf32, #tpu.memory_space<vmem>>, vector<1x1x256xf32>
    %344 = vector.shape_cast %343 : vector<1x1x256xf32> to vector<1x256xf32>
    %345 = vector.broadcast %342 : f32 to vector<1x256xf32>
    %346 = arith.mulf %345, %344 : vector<1x256xf32>
    %347 = arith.addf %341, %346 : vector<1x256xf32>
    %c73 = arith.constant 73 : index
    %348 = memref.load %arg1[%c73] : memref<98xf32, #tpu.memory_space<smem>>
    %c1_169 = arith.constant 1 : index
    %c0_170 = arith.constant 0 : index
    %c128_171 = arith.constant 128 : index
    %349 = vector.load %arg5[%c1_169, %c0_170, %c128_171] : memref<2x1x512xf32, #tpu.memory_space<vmem>>, vector<1x1x256xf32>
    %350 = vector.shape_cast %349 : vector<1x1x256xf32> to vector<1x256xf32>
    %351 = vector.broadcast %348 : f32 to vector<1x256xf32>
    %352 = arith.mulf %351, %350 : vector<1x256xf32>
    %353 = arith.addf %347, %352 : vector<1x256xf32>
    %c80_172 = arith.constant 80 : index
    %354 = memref.load %arg1[%c80_172] : memref<98xf32, #tpu.memory_space<smem>>
    %c1_173 = arith.constant 1 : index
    %c0_174 = arith.constant 0 : index
    %c144_175 = arith.constant 144 : index
    %355 = vector.load %arg5[%c1_173, %c0_174, %c144_175] : memref<2x1x512xf32, #tpu.memory_space<vmem>>, vector<1x1x256xf32>
    %356 = vector.shape_cast %355 : vector<1x1x256xf32> to vector<1x256xf32>
    %357 = vector.broadcast %354 : f32 to vector<1x256xf32>
    %358 = arith.mulf %357, %356 : vector<1x256xf32>
    %359 = arith.addf %353, %358 : vector<1x256xf32>
    %c87 = arith.constant 87 : index
    %360 = memref.load %arg1[%c87] : memref<98xf32, #tpu.memory_space<smem>>
    %c1_176 = arith.constant 1 : index
    %c0_177 = arith.constant 0 : index
    %c160_178 = arith.constant 160 : index
    %361 = vector.load %arg5[%c1_176, %c0_177, %c160_178] : memref<2x1x512xf32, #tpu.memory_space<vmem>>, vector<1x1x256xf32>
    %362 = vector.shape_cast %361 : vector<1x1x256xf32> to vector<1x256xf32>
    %363 = vector.broadcast %360 : f32 to vector<1x256xf32>
    %364 = arith.mulf %363, %362 : vector<1x256xf32>
    %365 = arith.addf %359, %364 : vector<1x256xf32>
    %c94_179 = arith.constant 94 : index
    %366 = memref.load %arg1[%c94_179] : memref<98xf32, #tpu.memory_space<smem>>
    %c1_180 = arith.constant 1 : index
    %c0_181 = arith.constant 0 : index
    %c176_182 = arith.constant 176 : index
    %367 = vector.load %arg5[%c1_180, %c0_181, %c176_182] : memref<2x1x512xf32, #tpu.memory_space<vmem>>, vector<1x1x256xf32>
    %368 = vector.shape_cast %367 : vector<1x1x256xf32> to vector<1x256xf32>
    %369 = vector.broadcast %366 : f32 to vector<1x256xf32>
    %370 = arith.mulf %369, %368 : vector<1x256xf32>
    %371 = arith.addf %365, %370 : vector<1x256xf32>
    %372 = arith.mulf %29, %371 : vector<1x256xf32>
    %373 = arith.addf %288, %372 : vector<1x256xf32>
    %c4_183 = arith.constant 4 : index
    %374 = memref.load %arg1[%c4_183] : memref<98xf32, #tpu.memory_space<smem>>
    %c0_184 = arith.constant 0 : index
    %c0_185 = arith.constant 0 : index
    %c81 = arith.constant 81 : index
    %375 = vector.load %arg5[%c0_184, %c0_185, %c81] : memref<2x1x512xf32, #tpu.memory_space<vmem>>, vector<1x1x256xf32>
    %376 = vector.shape_cast %375 : vector<1x1x256xf32> to vector<1x256xf32>
    %377 = vector.broadcast %374 : f32 to vector<1x256xf32>
    %378 = arith.mulf %377, %376 : vector<1x256xf32>
    %c11 = arith.constant 11 : index
    %379 = memref.load %arg1[%c11] : memref<98xf32, #tpu.memory_space<smem>>
    %c0_186 = arith.constant 0 : index
    %c0_187 = arith.constant 0 : index
    %c97 = arith.constant 97 : index
    %380 = vector.load %arg5[%c0_186, %c0_187, %c97] : memref<2x1x512xf32, #tpu.memory_space<vmem>>, vector<1x1x256xf32>
    %381 = vector.shape_cast %380 : vector<1x1x256xf32> to vector<1x256xf32>
    %382 = vector.broadcast %379 : f32 to vector<1x256xf32>
    %383 = arith.mulf %382, %381 : vector<1x256xf32>
    %384 = arith.addf %378, %383 : vector<1x256xf32>
    %c18 = arith.constant 18 : index
    %385 = memref.load %arg1[%c18] : memref<98xf32, #tpu.memory_space<smem>>
    %c0_188 = arith.constant 0 : index
    %c0_189 = arith.constant 0 : index
    %c113 = arith.constant 113 : index
    %386 = vector.load %arg5[%c0_188, %c0_189, %c113] : memref<2x1x512xf32, #tpu.memory_space<vmem>>, vector<1x1x256xf32>
    %387 = vector.shape_cast %386 : vector<1x1x256xf32> to vector<1x256xf32>
    %388 = vector.broadcast %385 : f32 to vector<1x256xf32>
    %389 = arith.mulf %388, %387 : vector<1x256xf32>
    %390 = arith.addf %384, %389 : vector<1x256xf32>
    %c25 = arith.constant 25 : index
    %391 = memref.load %arg1[%c25] : memref<98xf32, #tpu.memory_space<smem>>
    %c0_190 = arith.constant 0 : index
    %c0_191 = arith.constant 0 : index
    %c129 = arith.constant 129 : index
    %392 = vector.load %arg5[%c0_190, %c0_191, %c129] : memref<2x1x512xf32, #tpu.memory_space<vmem>>, vector<1x1x256xf32>
    %393 = vector.shape_cast %392 : vector<1x1x256xf32> to vector<1x256xf32>
    %394 = vector.broadcast %391 : f32 to vector<1x256xf32>
    %395 = arith.mulf %394, %393 : vector<1x256xf32>
    %396 = arith.addf %390, %395 : vector<1x256xf32>
    %c32 = arith.constant 32 : index
    %397 = memref.load %arg1[%c32] : memref<98xf32, #tpu.memory_space<smem>>
    %c0_192 = arith.constant 0 : index
    %c0_193 = arith.constant 0 : index
    %c145 = arith.constant 145 : index
    %398 = vector.load %arg5[%c0_192, %c0_193, %c145] : memref<2x1x512xf32, #tpu.memory_space<vmem>>, vector<1x1x256xf32>
    %399 = vector.shape_cast %398 : vector<1x1x256xf32> to vector<1x256xf32>
    %400 = vector.broadcast %397 : f32 to vector<1x256xf32>
    %401 = arith.mulf %400, %399 : vector<1x256xf32>
    %402 = arith.addf %396, %401 : vector<1x256xf32>
    %c39 = arith.constant 39 : index
    %403 = memref.load %arg1[%c39] : memref<98xf32, #tpu.memory_space<smem>>
    %c0_194 = arith.constant 0 : index
    %c0_195 = arith.constant 0 : index
    %c161 = arith.constant 161 : index
    %404 = vector.load %arg5[%c0_194, %c0_195, %c161] : memref<2x1x512xf32, #tpu.memory_space<vmem>>, vector<1x1x256xf32>
    %405 = vector.shape_cast %404 : vector<1x1x256xf32> to vector<1x256xf32>
    %406 = vector.broadcast %403 : f32 to vector<1x256xf32>
    %407 = arith.mulf %406, %405 : vector<1x256xf32>
    %408 = arith.addf %402, %407 : vector<1x256xf32>
    %c46 = arith.constant 46 : index
    %409 = memref.load %arg1[%c46] : memref<98xf32, #tpu.memory_space<smem>>
    %c0_196 = arith.constant 0 : index
    %c0_197 = arith.constant 0 : index
    %c177 = arith.constant 177 : index
    %410 = vector.load %arg5[%c0_196, %c0_197, %c177] : memref<2x1x512xf32, #tpu.memory_space<vmem>>, vector<1x1x256xf32>
    %411 = vector.shape_cast %410 : vector<1x1x256xf32> to vector<1x256xf32>
    %412 = vector.broadcast %409 : f32 to vector<1x256xf32>
    %413 = arith.mulf %412, %411 : vector<1x256xf32>
    %414 = arith.addf %408, %413 : vector<1x256xf32>
    %c53 = arith.constant 53 : index
    %415 = memref.load %arg1[%c53] : memref<98xf32, #tpu.memory_space<smem>>
    %c1_198 = arith.constant 1 : index
    %c0_199 = arith.constant 0 : index
    %c81_200 = arith.constant 81 : index
    %416 = vector.load %arg5[%c1_198, %c0_199, %c81_200] : memref<2x1x512xf32, #tpu.memory_space<vmem>>, vector<1x1x256xf32>
    %417 = vector.shape_cast %416 : vector<1x1x256xf32> to vector<1x256xf32>
    %418 = vector.broadcast %415 : f32 to vector<1x256xf32>
    %419 = arith.mulf %418, %417 : vector<1x256xf32>
    %420 = arith.addf %414, %419 : vector<1x256xf32>
    %c60 = arith.constant 60 : index
    %421 = memref.load %arg1[%c60] : memref<98xf32, #tpu.memory_space<smem>>
    %c1_201 = arith.constant 1 : index
    %c0_202 = arith.constant 0 : index
    %c97_203 = arith.constant 97 : index
    %422 = vector.load %arg5[%c1_201, %c0_202, %c97_203] : memref<2x1x512xf32, #tpu.memory_space<vmem>>, vector<1x1x256xf32>
    %423 = vector.shape_cast %422 : vector<1x1x256xf32> to vector<1x256xf32>
    %424 = vector.broadcast %421 : f32 to vector<1x256xf32>
    %425 = arith.mulf %424, %423 : vector<1x256xf32>
    %426 = arith.addf %420, %425 : vector<1x256xf32>
    %c67 = arith.constant 67 : index
    %427 = memref.load %arg1[%c67] : memref<98xf32, #tpu.memory_space<smem>>
    %c1_204 = arith.constant 1 : index
    %c0_205 = arith.constant 0 : index
    %c113_206 = arith.constant 113 : index
    %428 = vector.load %arg5[%c1_204, %c0_205, %c113_206] : memref<2x1x512xf32, #tpu.memory_space<vmem>>, vector<1x1x256xf32>
    %429 = vector.shape_cast %428 : vector<1x1x256xf32> to vector<1x256xf32>
    %430 = vector.broadcast %427 : f32 to vector<1x256xf32>
    %431 = arith.mulf %430, %429 : vector<1x256xf32>
    %432 = arith.addf %426, %431 : vector<1x256xf32>
    %c74 = arith.constant 74 : index
    %433 = memref.load %arg1[%c74] : memref<98xf32, #tpu.memory_space<smem>>
    %c1_207 = arith.constant 1 : index
    %c0_208 = arith.constant 0 : index
    %c129_209 = arith.constant 129 : index
    %434 = vector.load %arg5[%c1_207, %c0_208, %c129_209] : memref<2x1x512xf32, #tpu.memory_space<vmem>>, vector<1x1x256xf32>
    %435 = vector.shape_cast %434 : vector<1x1x256xf32> to vector<1x256xf32>
    %436 = vector.broadcast %433 : f32 to vector<1x256xf32>
    %437 = arith.mulf %436, %435 : vector<1x256xf32>
    %438 = arith.addf %432, %437 : vector<1x256xf32>
    %c81_210 = arith.constant 81 : index
    %439 = memref.load %arg1[%c81_210] : memref<98xf32, #tpu.memory_space<smem>>
    %c1_211 = arith.constant 1 : index
    %c0_212 = arith.constant 0 : index
    %c145_213 = arith.constant 145 : index
    %440 = vector.load %arg5[%c1_211, %c0_212, %c145_213] : memref<2x1x512xf32, #tpu.memory_space<vmem>>, vector<1x1x256xf32>
    %441 = vector.shape_cast %440 : vector<1x1x256xf32> to vector<1x256xf32>
    %442 = vector.broadcast %439 : f32 to vector<1x256xf32>
    %443 = arith.mulf %442, %441 : vector<1x256xf32>
    %444 = arith.addf %438, %443 : vector<1x256xf32>
    %c88 = arith.constant 88 : index
    %445 = memref.load %arg1[%c88] : memref<98xf32, #tpu.memory_space<smem>>
    %c1_214 = arith.constant 1 : index
    %c0_215 = arith.constant 0 : index
    %c161_216 = arith.constant 161 : index
    %446 = vector.load %arg5[%c1_214, %c0_215, %c161_216] : memref<2x1x512xf32, #tpu.memory_space<vmem>>, vector<1x1x256xf32>
    %447 = vector.shape_cast %446 : vector<1x1x256xf32> to vector<1x256xf32>
    %448 = vector.broadcast %445 : f32 to vector<1x256xf32>
    %449 = arith.mulf %448, %447 : vector<1x256xf32>
    %450 = arith.addf %444, %449 : vector<1x256xf32>
    %c95_217 = arith.constant 95 : index
    %451 = memref.load %arg1[%c95_217] : memref<98xf32, #tpu.memory_space<smem>>
    %c1_218 = arith.constant 1 : index
    %c0_219 = arith.constant 0 : index
    %c177_220 = arith.constant 177 : index
    %452 = vector.load %arg5[%c1_218, %c0_219, %c177_220] : memref<2x1x512xf32, #tpu.memory_space<vmem>>, vector<1x1x256xf32>
    %453 = vector.shape_cast %452 : vector<1x1x256xf32> to vector<1x256xf32>
    %454 = vector.broadcast %451 : f32 to vector<1x256xf32>
    %455 = arith.mulf %454, %453 : vector<1x256xf32>
    %456 = arith.addf %450, %455 : vector<1x256xf32>
    %457 = arith.mulf %30, %456 : vector<1x256xf32>
    %458 = arith.addf %373, %457 : vector<1x256xf32>
    %c5_221 = arith.constant 5 : index
    %459 = memref.load %arg1[%c5_221] : memref<98xf32, #tpu.memory_space<smem>>
    %c0_222 = arith.constant 0 : index
    %c0_223 = arith.constant 0 : index
    %c82 = arith.constant 82 : index
    %460 = vector.load %arg5[%c0_222, %c0_223, %c82] : memref<2x1x512xf32, #tpu.memory_space<vmem>>, vector<1x1x256xf32>
    %461 = vector.shape_cast %460 : vector<1x1x256xf32> to vector<1x256xf32>
    %462 = vector.broadcast %459 : f32 to vector<1x256xf32>
    %463 = arith.mulf %462, %461 : vector<1x256xf32>
    %c12 = arith.constant 12 : index
    %464 = memref.load %arg1[%c12] : memref<98xf32, #tpu.memory_space<smem>>
    %c0_224 = arith.constant 0 : index
    %c0_225 = arith.constant 0 : index
    %c98 = arith.constant 98 : index
    %465 = vector.load %arg5[%c0_224, %c0_225, %c98] : memref<2x1x512xf32, #tpu.memory_space<vmem>>, vector<1x1x256xf32>
    %466 = vector.shape_cast %465 : vector<1x1x256xf32> to vector<1x256xf32>
    %467 = vector.broadcast %464 : f32 to vector<1x256xf32>
    %468 = arith.mulf %467, %466 : vector<1x256xf32>
    %469 = arith.addf %463, %468 : vector<1x256xf32>
    %c19 = arith.constant 19 : index
    %470 = memref.load %arg1[%c19] : memref<98xf32, #tpu.memory_space<smem>>
    %c0_226 = arith.constant 0 : index
    %c0_227 = arith.constant 0 : index
    %c114 = arith.constant 114 : index
    %471 = vector.load %arg5[%c0_226, %c0_227, %c114] : memref<2x1x512xf32, #tpu.memory_space<vmem>>, vector<1x1x256xf32>
    %472 = vector.shape_cast %471 : vector<1x1x256xf32> to vector<1x256xf32>
    %473 = vector.broadcast %470 : f32 to vector<1x256xf32>
    %474 = arith.mulf %473, %472 : vector<1x256xf32>
    %475 = arith.addf %469, %474 : vector<1x256xf32>
    %c26 = arith.constant 26 : index
    %476 = memref.load %arg1[%c26] : memref<98xf32, #tpu.memory_space<smem>>
    %c0_228 = arith.constant 0 : index
    %c0_229 = arith.constant 0 : index
    %c130 = arith.constant 130 : index
    %477 = vector.load %arg5[%c0_228, %c0_229, %c130] : memref<2x1x512xf32, #tpu.memory_space<vmem>>, vector<1x1x256xf32>
    %478 = vector.shape_cast %477 : vector<1x1x256xf32> to vector<1x256xf32>
    %479 = vector.broadcast %476 : f32 to vector<1x256xf32>
    %480 = arith.mulf %479, %478 : vector<1x256xf32>
    %481 = arith.addf %475, %480 : vector<1x256xf32>
    %c33 = arith.constant 33 : index
    %482 = memref.load %arg1[%c33] : memref<98xf32, #tpu.memory_space<smem>>
    %c0_230 = arith.constant 0 : index
    %c0_231 = arith.constant 0 : index
    %c146 = arith.constant 146 : index
    %483 = vector.load %arg5[%c0_230, %c0_231, %c146] : memref<2x1x512xf32, #tpu.memory_space<vmem>>, vector<1x1x256xf32>
    %484 = vector.shape_cast %483 : vector<1x1x256xf32> to vector<1x256xf32>
    %485 = vector.broadcast %482 : f32 to vector<1x256xf32>
    %486 = arith.mulf %485, %484 : vector<1x256xf32>
    %487 = arith.addf %481, %486 : vector<1x256xf32>
    %c40 = arith.constant 40 : index
    %488 = memref.load %arg1[%c40] : memref<98xf32, #tpu.memory_space<smem>>
    %c0_232 = arith.constant 0 : index
    %c0_233 = arith.constant 0 : index
    %c162 = arith.constant 162 : index
    %489 = vector.load %arg5[%c0_232, %c0_233, %c162] : memref<2x1x512xf32, #tpu.memory_space<vmem>>, vector<1x1x256xf32>
    %490 = vector.shape_cast %489 : vector<1x1x256xf32> to vector<1x256xf32>
    %491 = vector.broadcast %488 : f32 to vector<1x256xf32>
    %492 = arith.mulf %491, %490 : vector<1x256xf32>
    %493 = arith.addf %487, %492 : vector<1x256xf32>
    %c47 = arith.constant 47 : index
    %494 = memref.load %arg1[%c47] : memref<98xf32, #tpu.memory_space<smem>>
    %c0_234 = arith.constant 0 : index
    %c0_235 = arith.constant 0 : index
    %c178 = arith.constant 178 : index
    %495 = vector.load %arg5[%c0_234, %c0_235, %c178] : memref<2x1x512xf32, #tpu.memory_space<vmem>>, vector<1x1x256xf32>
    %496 = vector.shape_cast %495 : vector<1x1x256xf32> to vector<1x256xf32>
    %497 = vector.broadcast %494 : f32 to vector<1x256xf32>
    %498 = arith.mulf %497, %496 : vector<1x256xf32>
    %499 = arith.addf %493, %498 : vector<1x256xf32>
    %c54 = arith.constant 54 : index
    %500 = memref.load %arg1[%c54] : memref<98xf32, #tpu.memory_space<smem>>
    %c1_236 = arith.constant 1 : index
    %c0_237 = arith.constant 0 : index
    %c82_238 = arith.constant 82 : index
    %501 = vector.load %arg5[%c1_236, %c0_237, %c82_238] : memref<2x1x512xf32, #tpu.memory_space<vmem>>, vector<1x1x256xf32>
    %502 = vector.shape_cast %501 : vector<1x1x256xf32> to vector<1x256xf32>
    %503 = vector.broadcast %500 : f32 to vector<1x256xf32>
    %504 = arith.mulf %503, %502 : vector<1x256xf32>
    %505 = arith.addf %499, %504 : vector<1x256xf32>
    %c61 = arith.constant 61 : index
    %506 = memref.load %arg1[%c61] : memref<98xf32, #tpu.memory_space<smem>>
    %c1_239 = arith.constant 1 : index
    %c0_240 = arith.constant 0 : index
    %c98_241 = arith.constant 98 : index
    %507 = vector.load %arg5[%c1_239, %c0_240, %c98_241] : memref<2x1x512xf32, #tpu.memory_space<vmem>>, vector<1x1x256xf32>
    %508 = vector.shape_cast %507 : vector<1x1x256xf32> to vector<1x256xf32>
    %509 = vector.broadcast %506 : f32 to vector<1x256xf32>
    %510 = arith.mulf %509, %508 : vector<1x256xf32>
    %511 = arith.addf %505, %510 : vector<1x256xf32>
    %c68 = arith.constant 68 : index
    %512 = memref.load %arg1[%c68] : memref<98xf32, #tpu.memory_space<smem>>
    %c1_242 = arith.constant 1 : index
    %c0_243 = arith.constant 0 : index
    %c114_244 = arith.constant 114 : index
    %513 = vector.load %arg5[%c1_242, %c0_243, %c114_244] : memref<2x1x512xf32, #tpu.memory_space<vmem>>, vector<1x1x256xf32>
    %514 = vector.shape_cast %513 : vector<1x1x256xf32> to vector<1x256xf32>
    %515 = vector.broadcast %512 : f32 to vector<1x256xf32>
    %516 = arith.mulf %515, %514 : vector<1x256xf32>
    %517 = arith.addf %511, %516 : vector<1x256xf32>
    %c75 = arith.constant 75 : index
    %518 = memref.load %arg1[%c75] : memref<98xf32, #tpu.memory_space<smem>>
    %c1_245 = arith.constant 1 : index
    %c0_246 = arith.constant 0 : index
    %c130_247 = arith.constant 130 : index
    %519 = vector.load %arg5[%c1_245, %c0_246, %c130_247] : memref<2x1x512xf32, #tpu.memory_space<vmem>>, vector<1x1x256xf32>
    %520 = vector.shape_cast %519 : vector<1x1x256xf32> to vector<1x256xf32>
    %521 = vector.broadcast %518 : f32 to vector<1x256xf32>
    %522 = arith.mulf %521, %520 : vector<1x256xf32>
    %523 = arith.addf %517, %522 : vector<1x256xf32>
    %c82_248 = arith.constant 82 : index
    %524 = memref.load %arg1[%c82_248] : memref<98xf32, #tpu.memory_space<smem>>
    %c1_249 = arith.constant 1 : index
    %c0_250 = arith.constant 0 : index
    %c146_251 = arith.constant 146 : index
    %525 = vector.load %arg5[%c1_249, %c0_250, %c146_251] : memref<2x1x512xf32, #tpu.memory_space<vmem>>, vector<1x1x256xf32>
    %526 = vector.shape_cast %525 : vector<1x1x256xf32> to vector<1x256xf32>
    %527 = vector.broadcast %524 : f32 to vector<1x256xf32>
    %528 = arith.mulf %527, %526 : vector<1x256xf32>
    %529 = arith.addf %523, %528 : vector<1x256xf32>
    %c89 = arith.constant 89 : index
    %530 = memref.load %arg1[%c89] : memref<98xf32, #tpu.memory_space<smem>>
    %c1_252 = arith.constant 1 : index
    %c0_253 = arith.constant 0 : index
    %c162_254 = arith.constant 162 : index
    %531 = vector.load %arg5[%c1_252, %c0_253, %c162_254] : memref<2x1x512xf32, #tpu.memory_space<vmem>>, vector<1x1x256xf32>
    %532 = vector.shape_cast %531 : vector<1x1x256xf32> to vector<1x256xf32>
    %533 = vector.broadcast %530 : f32 to vector<1x256xf32>
    %534 = arith.mulf %533, %532 : vector<1x256xf32>
    %535 = arith.addf %529, %534 : vector<1x256xf32>
    %c96_255 = arith.constant 96 : index
    %536 = memref.load %arg1[%c96_255] : memref<98xf32, #tpu.memory_space<smem>>
    %c1_256 = arith.constant 1 : index
    %c0_257 = arith.constant 0 : index
    %c178_258 = arith.constant 178 : index
    %537 = vector.load %arg5[%c1_256, %c0_257, %c178_258] : memref<2x1x512xf32, #tpu.memory_space<vmem>>, vector<1x1x256xf32>
    %538 = vector.shape_cast %537 : vector<1x1x256xf32> to vector<1x256xf32>
    %539 = vector.broadcast %536 : f32 to vector<1x256xf32>
    %540 = arith.mulf %539, %538 : vector<1x256xf32>
    %541 = arith.addf %535, %540 : vector<1x256xf32>
    %542 = arith.mulf %31, %541 : vector<1x256xf32>
    %543 = arith.addf %458, %542 : vector<1x256xf32>
    %c6_259 = arith.constant 6 : index
    %544 = memref.load %arg1[%c6_259] : memref<98xf32, #tpu.memory_space<smem>>
    %c0_260 = arith.constant 0 : index
    %c0_261 = arith.constant 0 : index
    %c83 = arith.constant 83 : index
    %545 = vector.load %arg5[%c0_260, %c0_261, %c83] : memref<2x1x512xf32, #tpu.memory_space<vmem>>, vector<1x1x256xf32>
    %546 = vector.shape_cast %545 : vector<1x1x256xf32> to vector<1x256xf32>
    %547 = vector.broadcast %544 : f32 to vector<1x256xf32>
    %548 = arith.mulf %547, %546 : vector<1x256xf32>
    %c13 = arith.constant 13 : index
    %549 = memref.load %arg1[%c13] : memref<98xf32, #tpu.memory_space<smem>>
    %c0_262 = arith.constant 0 : index
    %c0_263 = arith.constant 0 : index
    %c99 = arith.constant 99 : index
    %550 = vector.load %arg5[%c0_262, %c0_263, %c99] : memref<2x1x512xf32, #tpu.memory_space<vmem>>, vector<1x1x256xf32>
    %551 = vector.shape_cast %550 : vector<1x1x256xf32> to vector<1x256xf32>
    %552 = vector.broadcast %549 : f32 to vector<1x256xf32>
    %553 = arith.mulf %552, %551 : vector<1x256xf32>
    %554 = arith.addf %548, %553 : vector<1x256xf32>
    %c20 = arith.constant 20 : index
    %555 = memref.load %arg1[%c20] : memref<98xf32, #tpu.memory_space<smem>>
    %c0_264 = arith.constant 0 : index
    %c0_265 = arith.constant 0 : index
    %c115 = arith.constant 115 : index
    %556 = vector.load %arg5[%c0_264, %c0_265, %c115] : memref<2x1x512xf32, #tpu.memory_space<vmem>>, vector<1x1x256xf32>
    %557 = vector.shape_cast %556 : vector<1x1x256xf32> to vector<1x256xf32>
    %558 = vector.broadcast %555 : f32 to vector<1x256xf32>
    %559 = arith.mulf %558, %557 : vector<1x256xf32>
    %560 = arith.addf %554, %559 : vector<1x256xf32>
    %c27 = arith.constant 27 : index
    %561 = memref.load %arg1[%c27] : memref<98xf32, #tpu.memory_space<smem>>
    %c0_266 = arith.constant 0 : index
    %c0_267 = arith.constant 0 : index
    %c131 = arith.constant 131 : index
    %562 = vector.load %arg5[%c0_266, %c0_267, %c131] : memref<2x1x512xf32, #tpu.memory_space<vmem>>, vector<1x1x256xf32>
    %563 = vector.shape_cast %562 : vector<1x1x256xf32> to vector<1x256xf32>
    %564 = vector.broadcast %561 : f32 to vector<1x256xf32>
    %565 = arith.mulf %564, %563 : vector<1x256xf32>
    %566 = arith.addf %560, %565 : vector<1x256xf32>
    %c34 = arith.constant 34 : index
    %567 = memref.load %arg1[%c34] : memref<98xf32, #tpu.memory_space<smem>>
    %c0_268 = arith.constant 0 : index
    %c0_269 = arith.constant 0 : index
    %c147 = arith.constant 147 : index
    %568 = vector.load %arg5[%c0_268, %c0_269, %c147] : memref<2x1x512xf32, #tpu.memory_space<vmem>>, vector<1x1x256xf32>
    %569 = vector.shape_cast %568 : vector<1x1x256xf32> to vector<1x256xf32>
    %570 = vector.broadcast %567 : f32 to vector<1x256xf32>
    %571 = arith.mulf %570, %569 : vector<1x256xf32>
    %572 = arith.addf %566, %571 : vector<1x256xf32>
    %c41 = arith.constant 41 : index
    %573 = memref.load %arg1[%c41] : memref<98xf32, #tpu.memory_space<smem>>
    %c0_270 = arith.constant 0 : index
    %c0_271 = arith.constant 0 : index
    %c163 = arith.constant 163 : index
    %574 = vector.load %arg5[%c0_270, %c0_271, %c163] : memref<2x1x512xf32, #tpu.memory_space<vmem>>, vector<1x1x256xf32>
    %575 = vector.shape_cast %574 : vector<1x1x256xf32> to vector<1x256xf32>
    %576 = vector.broadcast %573 : f32 to vector<1x256xf32>
    %577 = arith.mulf %576, %575 : vector<1x256xf32>
    %578 = arith.addf %572, %577 : vector<1x256xf32>
    %c48 = arith.constant 48 : index
    %579 = memref.load %arg1[%c48] : memref<98xf32, #tpu.memory_space<smem>>
    %c0_272 = arith.constant 0 : index
    %c0_273 = arith.constant 0 : index
    %c179 = arith.constant 179 : index
    %580 = vector.load %arg5[%c0_272, %c0_273, %c179] : memref<2x1x512xf32, #tpu.memory_space<vmem>>, vector<1x1x256xf32>
    %581 = vector.shape_cast %580 : vector<1x1x256xf32> to vector<1x256xf32>
    %582 = vector.broadcast %579 : f32 to vector<1x256xf32>
    %583 = arith.mulf %582, %581 : vector<1x256xf32>
    %584 = arith.addf %578, %583 : vector<1x256xf32>
    %c55 = arith.constant 55 : index
    %585 = memref.load %arg1[%c55] : memref<98xf32, #tpu.memory_space<smem>>
    %c1_274 = arith.constant 1 : index
    %c0_275 = arith.constant 0 : index
    %c83_276 = arith.constant 83 : index
    %586 = vector.load %arg5[%c1_274, %c0_275, %c83_276] : memref<2x1x512xf32, #tpu.memory_space<vmem>>, vector<1x1x256xf32>
    %587 = vector.shape_cast %586 : vector<1x1x256xf32> to vector<1x256xf32>
    %588 = vector.broadcast %585 : f32 to vector<1x256xf32>
    %589 = arith.mulf %588, %587 : vector<1x256xf32>
    %590 = arith.addf %584, %589 : vector<1x256xf32>
    %c62 = arith.constant 62 : index
    %591 = memref.load %arg1[%c62] : memref<98xf32, #tpu.memory_space<smem>>
    %c1_277 = arith.constant 1 : index
    %c0_278 = arith.constant 0 : index
    %c99_279 = arith.constant 99 : index
    %592 = vector.load %arg5[%c1_277, %c0_278, %c99_279] : memref<2x1x512xf32, #tpu.memory_space<vmem>>, vector<1x1x256xf32>
    %593 = vector.shape_cast %592 : vector<1x1x256xf32> to vector<1x256xf32>
    %594 = vector.broadcast %591 : f32 to vector<1x256xf32>
    %595 = arith.mulf %594, %593 : vector<1x256xf32>
    %596 = arith.addf %590, %595 : vector<1x256xf32>
    %c69 = arith.constant 69 : index
    %597 = memref.load %arg1[%c69] : memref<98xf32, #tpu.memory_space<smem>>
    %c1_280 = arith.constant 1 : index
    %c0_281 = arith.constant 0 : index
    %c115_282 = arith.constant 115 : index
    %598 = vector.load %arg5[%c1_280, %c0_281, %c115_282] : memref<2x1x512xf32, #tpu.memory_space<vmem>>, vector<1x1x256xf32>
    %599 = vector.shape_cast %598 : vector<1x1x256xf32> to vector<1x256xf32>
    %600 = vector.broadcast %597 : f32 to vector<1x256xf32>
    %601 = arith.mulf %600, %599 : vector<1x256xf32>
    %602 = arith.addf %596, %601 : vector<1x256xf32>
    %c76 = arith.constant 76 : index
    %603 = memref.load %arg1[%c76] : memref<98xf32, #tpu.memory_space<smem>>
    %c1_283 = arith.constant 1 : index
    %c0_284 = arith.constant 0 : index
    %c131_285 = arith.constant 131 : index
    %604 = vector.load %arg5[%c1_283, %c0_284, %c131_285] : memref<2x1x512xf32, #tpu.memory_space<vmem>>, vector<1x1x256xf32>
    %605 = vector.shape_cast %604 : vector<1x1x256xf32> to vector<1x256xf32>
    %606 = vector.broadcast %603 : f32 to vector<1x256xf32>
    %607 = arith.mulf %606, %605 : vector<1x256xf32>
    %608 = arith.addf %602, %607 : vector<1x256xf32>
    %c83_286 = arith.constant 83 : index
    %609 = memref.load %arg1[%c83_286] : memref<98xf32, #tpu.memory_space<smem>>
    %c1_287 = arith.constant 1 : index
    %c0_288 = arith.constant 0 : index
    %c147_289 = arith.constant 147 : index
    %610 = vector.load %arg5[%c1_287, %c0_288, %c147_289] : memref<2x1x512xf32, #tpu.memory_space<vmem>>, vector<1x1x256xf32>
    %611 = vector.shape_cast %610 : vector<1x1x256xf32> to vector<1x256xf32>
    %612 = vector.broadcast %609 : f32 to vector<1x256xf32>
    %613 = arith.mulf %612, %611 : vector<1x256xf32>
    %614 = arith.addf %608, %613 : vector<1x256xf32>
    %c90 = arith.constant 90 : index
    %615 = memref.load %arg1[%c90] : memref<98xf32, #tpu.memory_space<smem>>
    %c1_290 = arith.constant 1 : index
    %c0_291 = arith.constant 0 : index
    %c163_292 = arith.constant 163 : index
    %616 = vector.load %arg5[%c1_290, %c0_291, %c163_292] : memref<2x1x512xf32, #tpu.memory_space<vmem>>, vector<1x1x256xf32>
    %617 = vector.shape_cast %616 : vector<1x1x256xf32> to vector<1x256xf32>
    %618 = vector.broadcast %615 : f32 to vector<1x256xf32>
    %619 = arith.mulf %618, %617 : vector<1x256xf32>
    %620 = arith.addf %614, %619 : vector<1x256xf32>
    %c97_293 = arith.constant 97 : index
    %621 = memref.load %arg1[%c97_293] : memref<98xf32, #tpu.memory_space<smem>>
    %c1_294 = arith.constant 1 : index
    %c0_295 = arith.constant 0 : index
    %c179_296 = arith.constant 179 : index
    %622 = vector.load %arg5[%c1_294, %c0_295, %c179_296] : memref<2x1x512xf32, #tpu.memory_space<vmem>>, vector<1x1x256xf32>
    %623 = vector.shape_cast %622 : vector<1x1x256xf32> to vector<1x256xf32>
    %624 = vector.broadcast %621 : f32 to vector<1x256xf32>
    %625 = arith.mulf %624, %623 : vector<1x256xf32>
    %626 = arith.addf %620, %625 : vector<1x256xf32>
    %627 = arith.mulf %32, %626 : vector<1x256xf32>
    %628 = arith.addf %543, %627 : vector<1x256xf32>
    %629 = arith.negf %628 : vector<1x256xf32>
    %630 = math.exp %629 : vector<1x256xf32>
    %cst_297 = arith.constant 1.000000e+00 : f32
    %631 = vector.broadcast %cst_297 : f32 to vector<1x256xf32>
    %632 = arith.addf %631, %630 : vector<1x256xf32>
    %633 = arith.divf %631, %632 : vector<1x256xf32>
    %c0_298 = arith.constant 0 : index
    %c0_299 = arith.constant 0 : index
    %c0_300 = arith.constant 0 : index
    %634 = vector.load %arg4[%c0_298, %c0_299, %c0_300] : memref<1x1x256xf32, #tpu.memory_space<vmem>>, vector<1x1x256xf32>
    %635 = vector.shape_cast %634 : vector<1x1x256xf32> to vector<1x256xf32>
    %636 = vector.shape_cast %633 : vector<1x256xf32> to vector<1x1x256xf32>
    tpu.vector_store %arg4[%c0_298, %c0_299, %c0_300], %636 {strides = array<i32>} : memref<1x1x256xf32, #tpu.memory_space<vmem>>, vector<1x1x256xf32>,
    return
  }
  func.func @transform_0(%arg0: i32) -> i32 {
    %c0_i32 = arith.constant 0 : i32
    %c0_i32_0 = arith.constant 0 : i32
    return %c0_i32 : i32
  }
  func.func @transform_1(%arg0: i32) -> (i32, i32) {
    %c0_i32 = arith.constant 0 : i32
    %c0_i32_0 = arith.constant 0 : i32
    %c0_i32_1 = arith.constant 0 : i32
    return %c0_i32, %c0_i32_0 : i32, i32
  }
  func.func @transform_2(%arg0: i32) -> (i32, i32, i32) {
    %c0_i32 = arith.constant 0 : i32
    %c0_i32_0 = arith.constant 0 : i32
    %c0_i32_1 = arith.constant 0 : i32
    return %arg0, %c0_i32, %c0_i32_0 : i32, i32, i32
  }
  func.func @transform_3(%arg0: i32) -> (i32, i32, i32) {
    %c0_i32 = arith.constant 0 : i32
    %c0_i32_0 = arith.constant 0 : i32
    %c0_i32_1 = arith.constant 0 : i32
    return %arg0, %c0_i32, %c0_i32_0 : i32, i32, i32
  }
}

</mosaic_0001>

<bundles_post_ra>
// kernel: tpu_custom_call.1
= control target key start
LH: loop header
LB: loop body
LE: loop exit
PB: predicated region body
PF: predicated region fallthrough
CT: control target
= control target key end

     0   :  { %8 = vsyncpa [#allocation6], 0  ;;  %s2381_s0 = inlined_call_operand.hbm [shape: f32[98], index: 0, kind: input, shape index: {}]   ;;  %s2382_s1 = inlined_call_operand.hbm [shape: f32[7,256], index: 1, kind: input, shape index: {}]   ;;  %s2383_s2 = inlined_call_operand.hbm [shape: f32[2,4,256], index: 2, kind: input, shape index: {}]   ;;  %s2384_s3 = inlined_call_operand.hbm [shape: f32[2,1,256], index: 3, kind: output, shape index: {}]  }
   0x1   :  { %9 = vsyncpa [#allocation4], 0 }
   0x2   :  { %10 = vsyncpa [#allocation9], 0 }
   0x3   :  { %12 = vsyncpa [#allocation9 + $0x1], 0 }
   0x4   :  { %13 = vsyncpa [#allocation5], 0 }
   0x5   :  { %15 = vsyncpa [#allocation5 + $0x1], 0  ;;  %s1743_s12 = smov 0   ;;  %s1745_s13 = smov 0  }
   0x6   :  { %s1747_s14 = smov 0   ;;  %s1749_s15 = smov 0  }
   0x7 LB: > { %s1764_s16 = sadd.s32 4294967295, %s1706_s15   ;;  %s1351_s17 = sadd.s32 4294967294, %s1706_s15   ;;  %s1706_s15 = sphi %s1749_s15, %s2396_s15   ;;  %s1702_s14 = sphi %s1747_s14, %s2395_s14   ;;  %s1698_s13 = sphi %s1745_s13, %s2394_s13   ;;  %s1694_s12 = sphi %s1743_s12, %s2393_s12  }
   0x8   : > { %p83_p0 = scmp.ne.s32.totalorder %s1698_s13, %s1694_s12  ;;  %p84_p1 = scmp.eq.s32.totalorder %s1764_s16, 0 }
   0x9   : > { %p107_p2 = scmp.eq.s32.totalorder %s1764_s16, 1  ;;  %p113_p3 = scmp.eq.s32.totalorder %s1351_s17, 1 }
   0xa   : > { %p1773_p4 = por %p84_p1, %p83_p0  ;;  %p1352_p5 = scmp.ge.s32.totalorder %s1706_s15, 1 }
   0xb   : > { %p1778_p6 = por %p113_p3, %p83_p0  ;;  %p120_p7 = scmp.lt.s32.totalorder %s1706_s15, 3 }
   0xc   : > { %s132_s22 = sshll.u32 %s2381_s0, 4  ;;  %s142_s26 = sshll.u32 %s2382_s1, 4  ;;  %s133_s22 = int_to_ptr.hbm [resolvable:$true] %s132_s22  ;;  %s143_s26 = int_to_ptr.hbm [resolvable:$true] %s142_s26 }
   0xd   : > { %p1786_p8 = pnand %p1352_p5, %p120_p7  ;;  %s1708_s27 = smov [#allocation7]  }
   0xe   : > { %s144_s28 = sshll.u32 %s1708_s27, 4  ;;  %s1709_s29 = smov [#allocation3]   ;;  %s145_s28 = int_to_ptr.vmem [resolvable:$true] %s144_s28 }
   0xf   : > { %p1482_p10 = pneg %p1786_p8  ;;  %s1799_s30 = sadd.s32 1, %s1706_s15  }
  0x10   : > { %s70_s4 = sadd.s32 1, %s1702_s14  ;;  %s67_s5 = ssub.s32 %s1706_s15, %s1799_s30 }
  0x11   : > { %p1483_p11 = pnand %p1482_p10, %p84_p1  ;;  %p77_p12 = scmp.ne.s32.totalorder %s1702_s14, %s1698_s13 }
  0x12   : > { %p68_p13 = scmp.eq.s32.totalorder %s67_s5, 0  ;;  %p78_p0 = scmp.eq.s32.totalorder %s1706_s15, 0 }
  0x13   : > { %1485 = dma.hbm_to_smem (!%p1483_p11), %s133_s22, 16, %s1709_s29, [#allocation6]  }
  0x14   : > { %1488 = dma.hbm_to_vmem [thread:$0]  (!%p1483_p11), %s143_s26, 256, %s145_s28, [#allocation4]  }
  0x15   : > { %p1809_p3 = por %p107_p2, %p77_p12  ;;  %p1499_p5 = scmp.lt.s32.totalorder %s1706_s15, 2 }
  0x16   : > { %s1815_s7 = scalar_select %p68_p13, %s1702_s14, %s70_s4  }
  0x17   : > { %p79_p7 = por %p78_p0, %p77_p12  ;;  %s155_s8 = sand.u32 1, %s1702_s14  }
  0x18   : > { %s1356_s9 = sshll.u32 %s155_s8, 3  ;;  %s1469_s10 = sshll.u32 %s1706_s15, 3 }
  0x19   : > { %s164_s20 = scalar_lea.hbm %s2383_s2, %s1469_s10  ;;  %s159_s21 = scalar_lea.vmem [#allocation8], %s1356_s9 }
  0x1a   : > { %s168_s22 = sshll.u32 %s159_s21, 4  ;;  %s166_s24 = sshll.u32 %s164_s20, 4  ;;  %s169_s22 = int_to_ptr.vmem [resolvable:$true] %s168_s22  ;;  %s167_s24 = int_to_ptr.hbm [resolvable:$true] %s166_s24 }
  0x1b   : > { %p1822_p2 = pnand %p1499_p5, %p79_p7  ;;  %s156_s26 = scalar_lea.sflag [#allocation9], %s155_s8 }
  0x1c   : > { %s1602_s27 = sshra.s32 %s167_s24, 4  ;;  %s1609_s5 = scalar_lea.hbm %s2383_s2, 16  ;;  %s1603_s27 = int_to_ptr.hbm [resolvable:$true] %s1602_s27 }
  0x1d   : > { %s1604_s28 = scalar_lea.hbm %s1603_s27, 8  ;;  %p1606_p11 = pneg %p1822_p2 }
  0x1e   : > { %p1605_p10 = scmp.ne.s32.totalorder %s1603_s27, %s1604_s28  ;;  %p1610_p0 = scmp.lt.s32.totalorder %s1603_s27, %s2383_s2 }
  0x1f   : > { %p1611_p5 = scmp.lt.s32.totalorder %s1609_s5, %s1604_s28 }
  0x20   : > { %p1607_p12 = pnand %p1606_p11, %p1605_p10 }
  0x21   : > { %p1612_p7 = por %p1611_p5, %p1610_p0 }
  0x22   : > { %p1608_p13 = pneg %p1607_p12 }
  0x24   : > { %p1613_p9 = pnand %p1612_p7, %p1608_p13 }
  0x26   : > { %1616 = shalt.err (!%p1613_p9)
}
  0x27   : > { %1492 = dma.hbm_to_vmem [thread:$0]  (!%p1822_p2), %s167_s24, 128, %s169_s22, %s156_s26  }
  0x28   : > { %177 = sbr.rel (%p1786_p8) target bundleno = 594 (0x252), region = 32 }
  0x2d   : > { %1677 = dma.done.wait (%p84_p1), [#allocation6], 16  }
  0x2e   : > { %1679 = vsyncadd (%p84_p1), [#allocation6], 4294967280 }
  0x2f   : > { %1681 = dma.done.wait (%p84_p1), [#allocation4], 256  }
  0x30   : > { %1683 = vsyncadd (%p84_p1), [#allocation4], 4294967040  ;;  %s1847_s8 = sand.u32 1, %s1698_s13  }
  0x31   : > { %s1362_s23 = sshll.u32 %s1847_s8, 3  ;;  %s190_s11 = scalar_lea.sflag [#allocation9], %s1847_s8 }
  0x32   : > { %s193_s17 = scalar_lea.vmem [#allocation8], %s1362_s23 }
  0x33   : > { %1685 = dma.done.wait (%p1773_p4), %s190_s11, 128  }
  0x34   : > { %1687 = vsyncadd (%p1773_p4), %s190_s11, 4294967168 }
  0x35   : > { %199 = sfence }
  0x36   : > { %v218_v0 = vld [vmem:[%s193_s17] ss:$4 sm:$0x3]  ;;  %v1364_v1 = vld [vmem:[%s193_s17 + $0x1] ss:$4 sm:$0x3]  ;;  %v232_v2 = vlaneseq }
  0x37   : > { %v222_v3 = vmax.f32 %v218_v0, %v1364_v1  ;;  %v1365_v4 = vld [vmem:[%s193_s17 + $0x2] ss:$4 sm:$0x3]  ;;  %v221_v5 = vadd.f32 %v1364_v1, %v218_v0  ;;  %v1366_v6 = vld [vmem:[%s193_s17 + $0x3] ss:$4 sm:$0x3] }
  0x38   : > { %vm234_vm0 = vcmp.lt.s32.totalorder %v232_v2, 128  ;;  %v1710_v8 = vmov 0.0   ;;  %s1375_s20 = sld [smem:[#allocation3 + $0x3f]]  ;;  %vm1855_vm1 = vcmp.lt.s32.totalorder %v232_v2, 256  ;;  %s1711_s26 = smov 96   ;;  %vm269_vm2 = vcmask 916480  }
  0x39   : > { %v226_v7 = vmax.f32 %v222_v3, %v1365_v4  ;;  %237 = vst.msk [vmem:[#allocation2 + $0x4] sm:$0x1] %vm234_vm0, %v1710_v8  ;;  %v225_v9 = vadd.f32 %v1365_v4, %v221_v5  ;;  %s1374_s18 = sld [smem:[#allocation3 + $0x38]]  ;;  %s1712_s27 = smov 112   ;;  %vm280_vm3 = vcmask 785408   ;;  %vm291_vm4 = vcmask 654336  }
  0x3a   : > { %236 = vst.msk [vmem:[#allocation2] sm:$0x1] %vm234_vm0, %v1710_v8  ;;  %s1376_s21 = sld [smem:[#allocation3 + $0x46]]  ;;  %s1713_s4 = smov 80   ;;  %vm303_vm5 = vcmask 523264   ;;  %vm314_vm6 = vcmask 392192  }
  0x3b   : > { %v230_v11 = vmax.f32 %v226_v7, %v1366_v6  ;;  %v229_v12 = vadd.f32 %v1366_v6, %v225_v9  ;;  %238 = vst.msk [vmem:[#allocation2 + $0x3] sm:$0x1] %vm234_vm0, %v1710_v8  ;;  %s1369_s22 = sld [smem:[#allocation3 + $0x15]]  ;;  %s1714_s23 = smov 48   ;;  %vm325_vm7 = vcmask 261120   ;;  %vm399_vm8 = vcmask 416768  }
  0x3c   : > { %239 = vst.msk [vmem:[#allocation2 + $0x7] sm:$0x1] %vm234_vm0, %v1710_v8  ;;  %s1367_s24 = sld [smem:[#allocation3 + $0x7]]  ;;  %s1715_s17 = smov 64   ;;  %vm535_vm9 = vcmask 408576   ;;  %vm671_vm10 = vcmask 400384  }
  0x3d   : > { %244 = vst.msk [vmem:[#allocation2 + $0x5] sm:$0x3] %vm1855_vm1, %v230_v11  ;;  %v231_v13 = vmul.f32 0.25, %v229_v12  ;;  %s1371_s25 = sld [smem:[#allocation3 + $0x23]]  ;;  %vm944_vm11 = vcmask 384000   ;;  %vm1080_vm12 = vcmask 375808  }
  0x3e   : > { %v345_v14 = vstv %s1375_s20  ;;  %s1370_s28 = sld [smem:[#allocation3 + $0x1c]]  ;;  %vm1216_vm13 = vcmask 367616  }
  0x3f   : > { %242 = vst.msk [vmem:[#allocation2 + $0x1] sm:$0x3] %vm1855_vm1, %v231_v13  ;;  %v335_v15 = vstv %s1374_s18  ;;  %s1368_s29 = sld [smem:[#allocation3 + $0xe]] }
  0x40   : > { %v355_v17 = vstv %s1376_s21  ;;  %s1372_s5 = sld [smem:[#allocation3 + $0x2a]]  ;;  %s1716_s21 = smov 32  }
  0x41   : > { %v285_v22 = vstv %s1369_s22  ;;  %s1378_s9 = sld [smem:[#allocation3 + $0x54]] }
  0x42   : > { %v263_v23 = vstv %s1367_s24  ;;  %s1377_s10 = sld [smem:[#allocation3 + $0x4d]] }
  0x43   : > { %v308_v24 = vstv %s1371_s25  ;;  %s1379_s11 = sld [smem:[#allocation3 + $0x5b]] }
  0x44   : > { %v1863_v16 = vld [vmem:[#allocation2 + $0x4] sm:$0x7]  ;;  %v297_v29 = vstv %s1370_s28  ;;  %s1381_s20 = sld [smem:[#allocation3 + $0x8]] }
  0x45   : > { %v346_v18 = vmul.f32 %v345_v14, %v1863_v16  ;;  %v336_v19 = vmul.f32 %v335_v15, %v1863_v16  ;;  %v356_v20 = vmul.f32 %v355_v17, %v1863_v16  ;;  %v274_v30 = vstv %s1368_s29  ;;  %v1886_v35 = vld [vmem:[#allocation2 + $0x5] sm:$0x7]  ;;  %s1383_s18 = sld [smem:[#allocation3 + $0x16]] }
  0x46   : > { %v1870_v21 = vld [vmem:[#allocation2] sm:$0x7]  ;;  %v319_v31 = vstv %s1372_s5  ;;  %s1382_s22 = sld [smem:[#allocation3 + $0xf]] }
  0x47   : > { %348 = vrot.lane.b32.xlu1 %v346_v18, %s1711_s26  ;;  %338 = vrot.lane.b32.xlu0 %v336_v19, %s1712_s27  ;;  %v286_v25 = vmul.f32 %v285_v22, %v1870_v21  ;;  %v264_v26 = vmul.f32 %v263_v23, %v1870_v21  ;;  %v1875_v27 = vld [vmem:[#allocation2 + $0x1] sm:$0x7]  ;;  %v275_v33 = vmul.f32 %v274_v30, %v1870_v21  ;;  %v376_v36 = vstv %s1378_s9  ;;  %s1384_s24 = sld [smem:[#allocation3 + $0x1d]] }
  0x48   : > { %358 = vrot.lane.b32.xlu2 %v356_v20, %s1713_s4  ;;  %v309_v28 = vmul.f32 %v308_v24, %v1875_v27  ;;  %v298_v32 = vmul.f32 %v297_v29, %v1875_v27  ;;  %v320_v34 = vmul.f32 %v319_v31, %v1875_v27  ;;  %v366_v37 = vstv %s1377_s10  ;;  %s1386_s25 = sld [smem:[#allocation3 + $0x2b]] }
  0x49   : > { %v386_v38 = vstv %s1379_s11  ;;  %v377_v39 = vmul.f32 %v376_v36, %v1886_v35  ;;  %v367_v40 = vmul.f32 %v366_v37, %v1886_v35  ;;  %s1385_s28 = sld [smem:[#allocation3 + $0x24]] }
  0x4a   : > { %v387_v41 = vmul.f32 %v386_v38, %v1886_v35  ;;  %v408_v42 = vstv %s1381_s20  ;;  %s1388_s29 = sld [smem:[#allocation3 + $0x39]] }
  0x4b   : > { %v428_v43 = vstv %s1383_s18  ;;  %v409_v45 = vmul.f32 %v408_v42, %v1870_v21  ;;  %s1390_s5 = sld [smem:[#allocation3 + $0x47]] }
  0x4c   : > { %v418_v44 = vstv %s1382_s22  ;;  %v429_v46 = vmul.f32 %v428_v43, %v1870_v21  ;;  %s1389_s9 = sld [smem:[#allocation3 + $0x40]] }
  0x4d   : > { %v419_v47 = vmul.f32 %v418_v44, %v1870_v21  ;;  %v438_v48 = vstv %s1384_s24  ;;  %s1391_s10 = sld [smem:[#allocation3 + $0x4e]] }
  0x4e   : > { %v458_v49 = vstv %s1386_s25  ;;  %v439_v51 = vmul.f32 %v438_v48, %v1875_v27  ;;  %s1393_s11 = sld [smem:[#allocation3 + $0x5c]] }
  0x4f   : > { %288 = vrot.lane.b32.xlu1 %v286_v25, %s1713_s4  ;;  %266 = vrot.lane.b32.xlu0 %v264_v26, %s1712_s27  ;;  %v448_v50 = vstv %s1385_s28  ;;  %v459_v52 = vmul.f32 %v458_v49, %v1875_v27  ;;  %s1392_s20 = sld [smem:[#allocation3 + $0x55]] }
  0x50   : > { %311 = vrot.lane.b32.xlu2 %v309_v28, %s1714_s23  ;;  %v449_v53 = vmul.f32 %v448_v50, %v1875_v27  ;;  %v472_v54 = vstv %s1388_s29  ;;  %s1397_s18 = sld [smem:[#allocation3 + $0x17]] }
  0x51   : > { %v492_v55 = vstv %s1390_s5  ;;  %v473_v57 = vmul.f32 %v472_v54, %v1863_v16  ;;  %s1396_s22 = sld [smem:[#allocation3 + $0x10]] }
  0x52   : > { %v482_v56 = vstv %s1389_s9  ;;  %v493_v58 = vmul.f32 %v492_v55, %v1863_v16  ;;  %s1395_s24 = sld [smem:[#allocation3 + $0x9]] }
  0x53   : > { %v483_v59 = vmul.f32 %v482_v56, %v1863_v16  ;;  %v502_v60 = vstv %s1391_s10  ;;  %s1400_s25 = sld [smem:[#allocation3 + $0x2c]] }
  0x54   : > { %v522_v61 = vstv %s1393_s11  ;;  %v503_v63 = vmul.f32 %v502_v60, %v1886_v35  ;;  %s1399_s28 = sld [smem:[#allocation3 + $0x25]] }
  0x55   : > { %v512_v62 = vstv %s1392_s20  ;;  %v523_v0 = vmul.f32 %v522_v61, %v1886_v35  ;;  %s1398_s29 = sld [smem:[#allocation3 + $0x1e]] }
  0x56   : > { %v513_v1 = vmul.f32 %v512_v62, %v1886_v35  ;;  %v564_v2 = vstv %s1397_s18  ;;  %s1404_s5 = sld [smem:[#allocation3 + $0x48]] }
  0x57   : > { %300 = vrot.lane.b32.xlu1 %v298_v32, %s1715_s17  ;;  %277 = vrot.lane.b32.xlu0 %v275_v33, %s1711_s26  ;;  %v554_v3 = vstv %s1396_s22  ;;  %v565_v5 = vmul.f32 %v564_v2, %v1870_v21  ;;  %s1403_s9 = sld [smem:[#allocation3 + $0x41]]  ;;  %v700_v32 = vld [vmem:[#allocation2 + $0x1] sm:$0x3] }
  0x58   : > { %322 = vrot.lane.b32.xlu2 %v320_v34, %s1716_s21  ;;  %v544_v4 = vstv %s1395_s24  ;;  %v555_v6 = vmul.f32 %v554_v3, %v1870_v21  ;;  %s1402_s10 = sld [smem:[#allocation3 + $0x3a]] }
  0x59   : > { %v545_v7 = vmul.f32 %v544_v4, %v1870_v21  ;;  %v594_v8 = vstv %s1400_s25  ;;  %s1407_s11 = sld [smem:[#allocation3 + $0x5d]] }
  0x5a   : > { %v584_v9 = vstv %s1399_s28  ;;  %v595_v12 = vmul.f32 %v594_v8, %v1875_v27  ;;  %s1406_s20 = sld [smem:[#allocation3 + $0x56]] }
  0x5b   : > { %v574_v11 = vstv %s1398_s29  ;;  %v585_v13 = vmul.f32 %v584_v9, %v1875_v27  ;;  %s1405_s18 = sld [smem:[#allocation3 + $0x4f]] }
  0x5c   : > { %v575_v14 = vmul.f32 %v574_v11, %v1875_v27  ;;  %v628_v15 = vstv %s1404_s5  ;;  %s1410_s22 = sld [smem:[#allocation3 + $0x11]] }
  0x5d   : > { %v618_v17 = vstv %s1403_s9  ;;  %v629_v19 = vmul.f32 %v628_v15, %v1863_v16  ;;  %s1409_s24 = sld [smem:[#allocation3 + $0xa]] }
  0x5e   : > { %v608_v18 = vstv %s1402_s10  ;;  %v619_v20 = vmul.f32 %v618_v17, %v1863_v16  ;;  %s1411_s25 = sld [smem:[#allocation3 + $0x18]] }
  0x5f   : > { %379 = vrot.lane.b32.xlu1 %v377_v39, %s1714_s23  ;;  %369 = vrot.lane.b32.xlu0 %v367_v40, %s1715_s17  ;;  %v609_v22 = vmul.f32 %v608_v18, %v1863_v16  ;;  %v658_v23 = vstv %s1407_s11  ;;  %s1424_s28 = sld [smem:[#allocation3 + $0x12]] }
  0x60   : > { %389 = vrot.lane.b32.xlu2 %v387_v41, %s1716_s21  ;;  %v648_v24 = vstv %s1406_s20  ;;  %v659_v26 = vmul.f32 %v658_v23, %v1886_v35  ;;  %s1423_s29 = sld [smem:[#allocation3 + $0xb]] }
  0x61   : > { %v638_v25 = vstv %s1405_s18  ;;  %v649_v28 = vmul.f32 %v648_v24, %v1886_v35  ;;  %s1437_s5 = sld [smem:[#allocation3 + $0xc]] }
  0x62   : > { %v639_v29 = vmul.f32 %v638_v25, %v1886_v35  ;;  %v690_v30 = vstv %s1410_s22  ;;  %s1425_s9 = sld [smem:[#allocation3 + $0x19]] }
  0x63   : > { %v680_v31 = vstv %s1409_s24  ;;  %v691_v36 = vmul.f32 %v690_v30, %v1870_v21  ;;  %s1412_s10 = sld [smem:[#allocation3 + $0x1f]] }
  0x64   : > { %v701_v33 = vstv %s1411_s25  ;;  %v681_v37 = vmul.f32 %v680_v31, %v1870_v21  ;;  %s1438_s11 = sld [smem:[#allocation3 + $0x13]] }
  0x65   : > { %v702_v38 = vmul.f32 %v701_v33, %v700_v32  ;;  %v827_v39 = vstv %s1424_s28  ;;  %s1413_s20 = sld [smem:[#allocation3 + $0x26]] }
  0x66   : > { %v817_v40 = vstv %s1423_s29  ;;  %v828_v43 = vmul.f32 %v827_v39, %v1870_v21  ;;  %s1451_s18 = sld [smem:[#allocation3 + $0xd]] }
  0x67   : > { %411 = vrot.lane.b32.xlu1 %v409_v45, %s1712_s27  ;;  %431 = vrot.lane.b32.xlu0 %v429_v46, %s1713_s4  ;;  %v953_v41 = vstv %s1437_s5  ;;  %v818_v44 = vmul.f32 %v817_v40, %v1870_v21  ;;  %s1426_s22 = sld [smem:[#allocation3 + $0x20]] }
  0x68   : > { %421 = vrot.lane.b32.xlu2 %v419_v47, %s1711_s26  ;;  %v954_v45 = vmul.f32 %v953_v41, %v1870_v21  ;;  %v837_v46 = vstv %s1425_s9  ;;  %s1452_s24 = sld [smem:[#allocation3 + $0x14]] }
  0x69   : > { %v711_v47 = vstv %s1412_s10  ;;  %v838_v50 = vmul.f32 %v837_v46, %v1875_v27  ;;  %s1439_s25 = sld [smem:[#allocation3 + $0x1a]] }
  0x6a   : > { %v963_v48 = vstv %s1438_s11  ;;  %s1414_s28 = sld [smem:[#allocation3 + $0x2d]] }
  0x6b   : > { %s258_s29 = sld [smem:[#allocation3]] }
  0x6c   : > { %v1089_v54 = vstv %s1451_s18  ;;  %s1977_s5 = sld [smem:[#allocation3 + $0x21]] }
  0x6d   : > { %v1090_v60 = vmul.f32 %v1089_v54, %v1870_v21  ;;  %s1979_s9 = sld [smem:[#allocation3 + $0x27]] }
  0x6e   : > { %v1099_v62 = vstv %s1452_s24  ;;  %s1982_s10 = sld [smem:[#allocation3 + $0x1b]] }
  0x6f   : > { %441 = vrot.lane.b32.xlu1 %v439_v51, %s1715_s17  ;;  %461 = vrot.lane.b32.xlu0 %v459_v52, %s1716_s21  ;;  %v712_v51 = vmul.f32 %v711_v47, %v1875_v27  ;;  %v964_v52 = vmul.f32 %v963_v48, %v1870_v21  ;;  %v1100_v4 = vmul.f32 %v1099_v62, %v1870_v21  ;;  %s1989_s11 = sld [smem:[#allocation3 + $0x31]] }
  0x70   : > { %451 = vrot.lane.b32.xlu2 %v449_v53, %s1714_s23  ;;  %v721_v53 = vstv %s1413_s20  ;;  %v731_v2 = vstv %s1414_s28  ;;  %s1994_s20 = sld [smem:[#allocation3 + $0x28]] }
  0x71   : > { %v732_v8 = vmul.f32 %v731_v2, %v1875_v27  ;;  %s1999_s18 = sld [smem:[#allocation3 + $0x2e]] }
  0x72   : > { %s2013_s24 = sld [smem:[#allocation3 + $0x1]] }
  0x73   : > { %s2024_s28 = sld [smem:[#allocation3 + $0x3b]] }
  0x74   : > { %v1109_v17 = vstv %s1982_s10  ;;  %s1717_s10 = smov 51  }
  0x77   : > { %475 = vrot.lane.b32.xlu1 %v473_v57, %s1712_s27  ;;  %495 = vrot.lane.b32.xlu0 %v493_v58, %s1713_s4  ;;  %v847_v57 = vstv %s1426_s22  ;;  %s2003_s22 = sld [smem:[#allocation3 + $0x22]]  ;;  %v867_v39 = vstv %s1999_s18 }
  0x78   : > { %485 = vrot.lane.b32.xlu2 %v483_v59, %s1711_s26  ;;  %v722_v59 = vmul.f32 %v721_v53, %v1875_v27  ;;  %v848_v61 = vmul.f32 %v847_v57, %v1875_v27  ;;  %s2093_s18 = sld [smem:[#allocation3 + $0x50]] }
  0x7f   : > { %505 = vrot.lane.b32.xlu1 %v503_v63, %s1715_s17  ;;  %525 = vrot.lane.b32.xlu0 %v523_v0, %s1716_s21  ;;  %v973_v63 = vstv %s1439_s25  ;;  %s2018_s25 = sld [smem:[#allocation3 + $0x2f]] }
  0x80   : > { %515 = vrot.lane.b32.xlu2 %v513_v1, %s1714_s23 }
  0x87   : > { %567 = vrot.lane.b32.xlu1 %v565_v5, %s1713_s4  ;;  %557 = vrot.lane.b32.xlu0 %v555_v6, %s1711_s26  ;;  %v974_v5 = vmul.f32 %v973_v63, %v1875_v27  ;;  %v260_v6 = vstv %s258_s29  ;;  %s2028_s29 = sld [smem:[#allocation3 + $0x29]]  ;;  %v1003_v63 = vstv %s2018_s25 }
  0x88   : > { %547 = vrot.lane.b32.xlu2 %v545_v7, %s1712_s27  ;;  %v261_v9 = vmul.f32 %v260_v6, %v1870_v21  ;;  %s2109_s25 = sld [smem:[#allocation3 + $0x33]] }
  0x8f   : > { %597 = vrot.lane.b32.xlu1 %v595_v12, %s1716_s21  ;;  %587 = vrot.lane.b32.xlu0 %v585_v13, %s1714_s23  ;;  %v983_v12 = vstv %s1977_s5  ;;  %v857_v13 = vstv %s1979_s9  ;;  %s2063_s5 = sld [smem:[#allocation3 + $0x32]] }
  0x90   : > { %577 = vrot.lane.b32.xlu2 %v575_v14, %s1715_s17  ;;  %v984_v23 = vmul.f32 %v983_v12, %v1875_v27  ;;  %v858_v24 = vmul.f32 %v857_v13, %v1875_v27  ;;  %v1004_v12 = vmul.f32 %v1003_v63, %v1875_v27  ;;  %s2073_s9 = sld [smem:[#allocation3 + $0x42]] }
  0x97   : > { %631 = vrot.lane.b32.xlu1 %v629_v19, %s1713_s4  ;;  %621 = vrot.lane.b32.xlu0 %v619_v20, %s1711_s26 }
  0x98   : > { %611 = vrot.lane.b32.xlu2 %v609_v22, %s1712_s27 }
  0x9f   : > { %661 = vrot.lane.b32.xlu1 %v659_v26, %s1716_s21  ;;  %651 = vrot.lane.b32.xlu0 %v649_v28, %s1714_s23  ;;  %v1110_v28 = vmul.f32 %v1109_v17, %v1875_v27 }
  0xa0   : > { %641 = vrot.lane.b32.xlu2 %v639_v29, %s1715_s17 }
  0xa2   : > { %v1943_v34 = vpop.permute.xlu2 %358 }
  0xa7   : > { %693 = vrot.lane.b32.xlu1 %v691_v36, %s1711_s26  ;;  %683 = vrot.lane.b32.xlu0 %v681_v37, %s1712_s27  ;;  %v331_v37 = vstv %s1989_s11  ;;  %s1418_s11 = sld [smem:[#allocation3 + $0x49]] }
  0xa8   : > { %704 = vrot.lane.b32.xlu2 %v702_v38, %s1713_s4  ;;  %v993_v38 = vstv %s1994_s20  ;;  %v332_v48 = vmul.f32 %v331_v37, %v1863_v16  ;;  %s1394_s20 = sld [smem:[#allocation3 + $0x2]] }
  0xaa   : > { %v1950_v42 = vpop.permute.xlu2 %311 }
  0xab   : > { %v313_v30 = vrot.slane %v1950_v42, 7 }
  0xaf   : > { %830 = vrot.lane.b32.xlu1 %v828_v43, %s1711_s26  ;;  %820 = vrot.lane.b32.xlu0 %v818_v44, %s1712_s27  ;;  %v1119_v44 = vstv %s2003_s22  ;;  %s1430_s22 = sld [smem:[#allocation3 + $0x3c]] }
  0xb0   : > { %956 = vrot.lane.b32.xlu2 %v954_v45, %s1712_s27  ;;  %v315_v45 = vsel %vm314_vm6, %v313_v30, %v1950_v42  ;;  %v1120_v54 = vmul.f32 %v1119_v44, %v1875_v27 }
  0xb2   : > { %v1958_v49 = vpop.permute.xlu2 %322 }
  0xb3   : > { %v324_v32 = vrot.slane %v1958_v49, 7 }
  0xb5   : > { %v326_v53 = vsel %vm325_vm7, %v324_v32, %v1958_v49 }
  0xb7   : > { %840 = vrot.lane.b32.xlu1 %v838_v50, %s1713_s4  ;;  %714 = vrot.lane.b32.xlu0 %v712_v51, %s1715_s17  ;;  %v994_v50 = vmul.f32 %v993_v38, %v1875_v27  ;;  %v868_v51 = vmul.f32 %v867_v39, %v1875_v27 }
  0xb8   : > { %966 = vrot.lane.b32.xlu2 %v964_v52, %s1711_s26 }
  0xb9   : > { %v1966_v55 = vpop.permute.xlu1 %348  ;;  %v1968_v56 = vpop.permute.xlu0 %338 }
  0xba   : > { %v1970_v58 = vpop.permute.xlu2 %389  ;;  %v340_v52 = vrot.slane %v1968_v56, 1  ;;  %v350_v57 = vrot.slane %v1966_v55, 1 }
  0xbc   : > { %v341_v62 = vsel %vm269_vm2, %v1968_v56, %v340_v52  ;;  %v351_v6 = vsel %vm280_vm3, %v1966_v55, %v350_v57 }
  0xbf   : > { %724 = vrot.lane.b32.xlu1 %v722_v59, %s1714_s23  ;;  %1092 = vrot.lane.b32.xlu0 %v1090_v60, %s1712_s27  ;;  %v405_v59 = vstv %s2013_s24  ;;  %s2107_s24 = sld [smem:[#allocation3 + $0x3e]] }
  0xc0   : > { %850 = vrot.lane.b32.xlu2 %v848_v61, %s1715_s17  ;;  %v360_v61 = vrot.slane %v1943_v34, 1 }
  0xc1   : > { %v289_v0 = vpop.permute.xlu1 %288  ;;  %v267_v1 = vpop.permute.xlu0 %266 }
  0xc2   : > { %v1984_v3 = vpop.permute.xlu2 %421  ;;  %v268_v7 = vrot.slane %v267_v1, 1  ;;  %v290_v18 = vrot.slane %v289_v0, 1 }
  0xc4   : > { %v270_v11 = vsel %vm269_vm2, %v267_v1, %v268_v7  ;;  %v292_v31 = vsel %vm291_vm4, %v289_v0, %v290_v18  ;;  %v745_v0 = vstv %s2024_s28  ;;  %v406_v1 = vmul.f32 %v405_v59, %v1870_v21  ;;  %s1718_s28 = smov 50  }
  0xc5   : > { %v272_v22 = vadd.f32 %v270_v11, %v261_v9  ;;  %v746_v13 = vmul.f32 %v745_v0, %v1863_v16 }
  0xc7   : > { %1102 = vrot.lane.b32.xlu1 %v1100_v4, %s1711_s26  ;;  %976 = vrot.lane.b32.xlu0 %v974_v5, %s1713_s4  ;;  %v1129_v5 = vstv %s2028_s29  ;;  %s1431_s29 = sld [smem:[#allocation3 + $0x43]] }
  0xc8   : > { %734 = vrot.lane.b32.xlu2 %v732_v8, %s1716_s21  ;;  %v423_v8 = vrot.slane %v1984_v3, 1  ;;  %v1130_v55 = vmul.f32 %v1129_v5, %v1875_v27 }
  0xc9   : > { %v301_v14 = vpop.permute.xlu1 %300  ;;  %v278_v15 = vpop.permute.xlu0 %277 }
  0xca   : > { %v279_v19 = vrot.slane %v278_v15, 1  ;;  %v2005_v20 = vpop.permute.xlu2 %451  ;;  %v302_v25 = vrot.slane %v301_v14, 7 }
  0xcb   : > { %v453_v32 = vrot.slane %v2005_v20, 7 }
  0xcc   : > { %v281_v26 = vsel %vm280_vm3, %v278_v15, %v279_v19  ;;  %v304_v36 = vsel %vm303_vm5, %v302_v25, %v301_v14  ;;  %v361_v14 = vsel %vm291_vm4, %v1943_v34, %v360_v61  ;;  %v391_v34 = vrot.slane %v1970_v58, 7 }
  0xcd   : > { %v283_v29 = vadd.f32 %v281_v26, %v272_v22 }
  0xce   : > { %v392_v38 = vsel %vm325_vm7, %v391_v34, %v1970_v58 }
  0xcf   : > { %v294_v33 = vadd.f32 %v292_v31, %v283_v29  ;;  %986 = vrot.lane.b32.xlu1 %v984_v23, %s1715_s17  ;;  %860 = vrot.lane.b32.xlu0 %v858_v24, %s1714_s23  ;;  %v424_v23 = vsel %vm280_vm3, %v1984_v3, %v423_v8 }
  0xd0   : > { %1112 = vrot.lane.b32.xlu2 %v1110_v28, %s1713_s4 }
  0xd1   : > { %v306_v40 = vadd.f32 %v304_v36, %v294_v33  ;;  %v380_v41 = vpop.permute.xlu1 %379  ;;  %v370_v43 = vpop.permute.xlu0 %369 }
  0xd2   : > { %v2032_v46 = vpop.permute.xlu2 %485  ;;  %v371_v7 = vrot.slane %v370_v43, 7  ;;  %v381_v15 = vrot.slane %v380_v41, 7 }
  0xd3   : > { %v317_v47 = vadd.f32 %v315_v45, %v306_v40  ;;  %v454_v45 = vsel %vm314_vm6, %v453_v32, %v2005_v20  ;;  %v881_v32 = vstv %s1430_s22  ;;  %s2160_s22 = sld [smem:[#allocation3 + $0x5f]] }
  0xd4   : > { %v372_v22 = vsel %vm303_vm5, %v371_v7, %v370_v43  ;;  %v382_v28 = vsel %vm314_vm6, %v381_v15, %v380_v41  ;;  %v468_v41 = vstv %s2063_s5  ;;  %s2120_s5 = sld [smem:[#allocation3 + $0x4b]] }
  0xd5   : > { %v328_v42 = vadd.f32 %v326_v53, %v317_v47 }
  0xd7   : > { %v333_v60 = vadd.f32 %v332_v48, %v328_v42  ;;  %996 = vrot.lane.b32.xlu1 %v994_v50, %s1714_s23  ;;  %870 = vrot.lane.b32.xlu0 %v868_v51, %s1716_s21  ;;  %v469_v48 = vmul.f32 %v468_v41, %v1863_v16  ;;  %v755_v51 = vstv %s2073_s9  ;;  %s2127_s9 = sld [smem:[#allocation3 + $0x5]] }
  0xd8   : > { %1122 = vrot.lane.b32.xlu2 %v1120_v54, %s1715_s17  ;;  %v487_v54 = vrot.slane %v2032_v46, 1 }
  0xd9   : > { %v343_v49 = vadd.f32 %v341_v62, %v333_v60  ;;  %v412_v2 = vpop.permute.xlu1 %411  ;;  %v432_v4 = vpop.permute.xlu0 %431  ;;  %v756_v60 = vmul.f32 %v755_v51, %v1863_v16 }
  0xda   : > { %v413_v9 = vrot.slane %v412_v2, 1  ;;  %v2056_v11 = vpop.permute.xlu2 %515  ;;  %v433_v24 = vrot.slane %v432_v4, 1  ;;  %v488_v62 = vsel %vm280_vm3, %v2032_v46, %v487_v54 }
  0xdb   : > { %v353_v56 = vadd.f32 %v351_v6, %v343_v49  ;;  %v765_v49 = vld [vmem:[#allocation2 + $0x5] sm:$0x3]  ;;  %v517_v6 = vrot.slane %v2056_v11, 7 }
  0xdc   : > { %v414_v17 = vsel %vm269_vm2, %v412_v2, %v413_v9  ;;  %v434_v3 = vsel %vm291_vm4, %v432_v4, %v433_v24 }
  0xdd   : > { %v363_v18 = vadd.f32 %v361_v14, %v353_v56  ;;  %v416_v19 = vadd.f32 %v414_v17, %v406_v1  ;;  %v766_v1 = vstv %s1418_s11  ;;  %v518_v17 = vsel %vm314_vm6, %v517_v6, %v2056_v11  ;;  %s2138_s11 = sld [smem:[#allocation3 + $0x58]] }
  0xde   : > { %v767_v46 = vmul.f32 %v766_v1, %v765_v49  ;;  %v950_v6 = vstv %s2127_s9  ;;  %s2185_s9 = sld [smem:[#allocation3 + $0x3d]] }
  0xdf   : > { %v374_v25 = vadd.f32 %v372_v22, %v363_v18  ;;  %v426_v26 = vadd.f32 %v424_v23, %v416_v19  ;;  %1006 = vrot.lane.b32.xlu1 %v1004_v12, %s1716_s21  ;;  %748 = vrot.lane.b32.xlu0 %v746_v13, %s1712_s27  ;;  %v541_v13 = vstv %s1394_s20  ;;  %v776_v23 = vstv %s2093_s18  ;;  %s2148_s20 = sld [smem:[#allocation3 + $0x57]] }
  0xe0   : > { %1132 = vrot.lane.b32.xlu2 %v1130_v55, %s1714_s23  ;;  %v542_v18 = vmul.f32 %v541_v13, %v1870_v21  ;;  %s2151_s18 = sld [smem:[#allocation3 + $0x3]]  ;;  %v951_v13 = vmul.f32 %v950_v6, %v1870_v21 }
  0xe1   : > { %v384_v29 = vadd.f32 %v382_v28, %v374_v25  ;;  %v442_v30 = vpop.permute.xlu1 %441  ;;  %v462_v31 = vpop.permute.xlu0 %461  ;;  %v436_v37 = vadd.f32 %v434_v3, %v426_v26 }
  0xe2   : > { %v443_v33 = vrot.slane %v442_v30, 7  ;;  %v548_v36 = vpop.permute.xlu2 %547  ;;  %v463_v40 = vrot.slane %v462_v31, 7 }
  0xe3   : > { %v394_v44 = vadd.f32 %v392_v38, %v384_v29  ;;  %v549_v14 = vrot.slane %v548_v36, 1  ;;  %v882_v38 = vmul.f32 %v881_v32, %v1863_v16 }
  0xe4   : > { %v444_v39 = vsel %vm303_vm5, %v443_v33, %v442_v30  ;;  %v464_v50 = vsel %vm325_vm7, %v463_v40, %v462_v31  ;;  %v777_v30 = vmul.f32 %v776_v23, %v1886_v35  ;;  %v1153_v40 = vstv %s2107_s24  ;;  %s2162_s24 = sld [smem:[#allocation3 + $0x30]] }
  0xe5   : > { %v446_v43 = vadd.f32 %v444_v39, %v436_v37  ;;  %v550_v22 = vsel %vm269_vm2, %v548_v36, %v549_v14  ;;  %v1154_v51 = vmul.f32 %v1153_v40, %v1863_v16 }
  0xe6   : > { %v552_v29 = vadd.f32 %v550_v22, %v542_v18  ;;  %v921_v18 = vstv %s2138_s11  ;;  %s1445_s11 = sld [smem:[#allocation3 + $0x44]] }
  0xe7   : > { %v456_v47 = vadd.f32 %v454_v45, %v446_v43  ;;  %396 = vrot.lane.b32.xlu0 %v394_v44, %s1717_s10  ;;  %s2130_s10 = sld [smem:[#allocation3 + $0x4a]] }
  0xe9   : > { %v466_v52 = vadd.f32 %v464_v50, %v456_v47  ;;  %v476_v58 = vpop.permute.xlu1 %475  ;;  %v496_v53 = vpop.permute.xlu0 %495  ;;  %v604_v47 = vstv %s2109_s25  ;;  %s2168_s25 = sld [smem:[#allocation3 + $0x45]] }
  0xea   : > { %v477_v42 = vrot.slane %v476_v58, 1  ;;  %v578_v57 = vpop.permute.xlu2 %577  ;;  %v497_v63 = vrot.slane %v496_v53, 1  ;;  %v605_v54 = vmul.f32 %v604_v47, %v1863_v16 }
  0xeb   : > { %v470_v59 = vadd.f32 %v469_v48, %v466_v52  ;;  %v579_v3 = vrot.slane %v578_v57, 7 }
  0xec   : > { %v478_v20 = vsel %vm269_vm2, %v476_v58, %v477_v42  ;;  %v498_v5 = vsel %vm291_vm4, %v496_v53, %v497_v63  ;;  %v891_v58 = vstv %s1431_s29  ;;  %s2180_s29 = sld [smem:[#allocation3 + $0x60]] }
  0xed   : > { %v480_v61 = vadd.f32 %v478_v20, %v470_v59  ;;  %v580_v39 = vsel %vm303_vm5, %v579_v3, %v578_v57  ;;  %v1037_v20 = vstv %s2120_s5  ;;  %s1719_s5 = smov 49  }
  0xef   : > { %v490_v0 = vadd.f32 %v488_v62, %v480_v61  ;;  %758 = vrot.lane.b32.xlu0 %v756_v60, %s1711_s26  ;;  %v892_v60 = vmul.f32 %v891_v58, %v1863_v16 }
  0xf1   : > { %v506_v2 = vpop.permute.xlu1 %505  ;;  %v526_v4 = vpop.permute.xlu0 %525  ;;  %v500_v9 = vadd.f32 %v498_v5, %v490_v0  ;;  %v1038_v5 = vmul.f32 %v1037_v20, %v1886_v35 }
  0xf2   : > { %v507_v7 = vrot.slane %v506_v2, 7  ;;  %v2097_v8 = vpop.permute.xlu2 %611  ;;  %v527_v12 = vrot.slane %v526_v4, 7 }
  0xf3   : > { %v613_v57 = vrot.slane %v2097_v8, 1 }
  0xf4   : > { %v508_v56 = vsel %vm303_vm5, %v507_v7, %v506_v2  ;;  %v528_v19 = vsel %vm325_vm7, %v527_v12, %v526_v4 }
  0xf5   : > { %v510_v15 = vadd.f32 %v508_v56, %v500_v9  ;;  %v614_v0 = vsel %vm269_vm2, %v2097_v8, %v613_v57  ;;  %v901_v56 = vstv %s2130_s10  ;;  %s1447_s10 = sld [smem:[#allocation3 + $0x52]] }
  0xf7   : > { %v520_v55 = vadd.f32 %v518_v17, %v510_v15  ;;  %769 = vrot.lane.b32.xlu0 %v767_v46, %s1713_s4  ;;  %v902_v15 = vmul.f32 %v901_v56, %v1886_v35 }
  0xf9   : > { %v530_v24 = vadd.f32 %v528_v19, %v520_v55  ;;  %v568_v25 = vpop.permute.xlu1 %567  ;;  %v558_v26 = vpop.permute.xlu0 %557 }
  0xfa   : > { %v569_v34 = vrot.slane %v568_v25, 1  ;;  %v559_v28 = vrot.slane %v558_v26, 1  ;;  %v2111_v11 = vpop.permute.xlu2 %641 }
  0xfb   : > { %532 = vrot.lane.b32.xlu1 %v530_v24, %s1718_s28  ;;  %v643_v46 = vrot.slane %v2111_v11, 7  ;;  %s2173_s28 = sld [smem:[#allocation3 + $0x4]]  ;;  %v1047_v6 = vstv %s1447_s10  ;;  %s1363_s10 = sshll.u32 %s1847_s8, 1 }
  0xfc   : > { %v560_v31 = vsel %vm280_vm3, %v558_v26, %v559_v28  ;;  %v570_v36 = vsel %vm291_vm4, %v568_v25, %v569_v34  ;;  %v922_v28 = vmul.f32 %v921_v18, %v1886_v35 }
  0xfd   : > { %v562_v33 = vadd.f32 %v560_v31, %v552_v29  ;;  %v644_v55 = vsel %vm303_vm5, %v643_v46, %v2111_v11 }
  0xff   : > { %v572_v37 = vadd.f32 %v570_v36, %v562_v33  ;;  %779 = vrot.lane.b32.xlu0 %v777_v30, %s1715_s17  ;;  %v786_v30 = vstv %s2148_s20  ;;  %v677_v33 = vstv %s2151_s18  ;;  %s1448_s20 = sld [smem:[#allocation3 + $0x59]] }
 0x100   : > { %s1433_s18 = sld [smem:[#allocation3 + $0x51]] }
 0x101   : > { %v598_v41 = vpop.permute.xlu1 %597  ;;  %v588_v43 = vpop.permute.xlu0 %587  ;;  %v582_v50 = vadd.f32 %v580_v39, %v572_v37  ;;  %v931_v39 = vstv %s2160_s22  ;;  %s1450_s22 = sld [smem:[#allocation3 + $0x6]] }
 0x102   : > { %v599_v44 = vrot.slane %v598_v41, 7  ;;  %v589_v45 = vrot.slane %v588_v43, 7  ;;  %v2123_v48 = vpop.permute.xlu2 %704 }
 0x103   : > { %884 = vrot.lane.b32.xlu1 %v882_v38, %s1712_s27  ;;  %v787_v38 = vmul.f32 %v786_v30, %v1886_v35 }
 0x104   : > { %v590_v52 = vsel %vm314_vm6, %v589_v45, %v588_v43  ;;  %v600_v42 = vsel %vm325_vm7, %v599_v44, %v598_v41  ;;  %v678_v41 = vmul.f32 %v677_v33, %v1870_v21  ;;  %v706_v44 = vrot.slane %v2123_v48, 7 }
 0x105   : > { %v592_v53 = vadd.f32 %v590_v52, %v582_v50  ;;  %v1139_v50 = vstv %s2162_s24  ;;  %s1462_s24 = sld [smem:[#allocation3 + $0x5a]] }
 0x106   : > { %v1140_v57 = vmul.f32 %v1139_v50, %v1875_v27  ;;  %v1017_v27 = vstv %s2185_s9  ;;  %s1722_s9 = smov 45  }
 0x107   : > { %v602_v59 = vadd.f32 %v600_v42, %v592_v53  ;;  %1156 = vrot.lane.b32.xlu0 %v1154_v51, %s1712_s27  ;;  %v932_v51 = vmul.f32 %v931_v39, %v1886_v35  ;;  %v1163_v53 = vstv %s2168_s25  ;;  %v1556_v39 = vld [vmem:[#allocation2 + $0x5] sm:$0x7]  ;;  %s1461_s25 = sld [smem:[#allocation3 + $0x53]] }
 0x109   : > { %v606_v61 = vadd.f32 %v605_v54, %v602_v59  ;;  %v632_v62 = vpop.permute.xlu1 %631  ;;  %v622_v63 = vpop.permute.xlu0 %621  ;;  %v707_v59 = vsel %vm291_vm4, %v706_v44, %v2123_v48 }
 0x10a   : > { %v633_v49 = vrot.slane %v632_v62, 1  ;;  %v623_v1 = vrot.slane %v622_v63, 1  ;;  %v957_v2 = vpop.permute.xlu2 %956 }
 0x10b   : > { %v616_v4 = vadd.f32 %v614_v0, %v606_v61  ;;  %894 = vrot.lane.b32.xlu1 %v892_v60, %s1711_s26  ;;  %v958_v7 = vrot.slane %v957_v2, 1  ;;  %v814_v60 = vstv %s2173_s28  ;;  %v1164_v61 = vmul.f32 %v1163_v53, %v1863_v16  ;;  %s1463_s28 = sld [smem:[#allocation3 + $0x61]] }
 0x10c   : > { %v624_v9 = vsel %vm280_vm3, %v622_v63, %v623_v1  ;;  %v634_v8 = vsel %vm291_vm4, %v632_v62, %v633_v49  ;;  %v1067_v62 = vstv %s2180_s29  ;;  %v815_v0 = vmul.f32 %v814_v60, %v1870_v21  ;;  %s2307_s29 = sld [smem:[#allocation3 + $0x37]] }
 0x10d   : > { %v626_v12 = vadd.f32 %v624_v9, %v616_v4  ;;  %v959_v17 = vsel %vm269_vm2, %v957_v2, %v958_v7  ;;  %v1068_v48 = vmul.f32 %v1067_v62, %v1886_v35  ;;  %v2208_v9 = vld [vmem:[#allocation2 + $0x4] sm:$0x7] }
 0x10e   : > { %v961_v25 = vadd.f32 %v959_v17, %v951_v13  ;;  %v1018_v21 = vmul.f32 %v2208_v9, %v1017_v27  ;;  %v1027_v17 = vstv %s1445_s11  ;;  %s1466_s11 = sshll.u32 %s1764_s16, 1  ;;  %s1242_s16 = scalar_lea.sflag [#allocation5], %s1847_s8 }
 0x10f   : > { %v636_v14 = vadd.f32 %v634_v8, %v626_v12  ;;  %1040 = vrot.lane.b32.xlu0 %v1038_v5, %s1713_s4  ;;  %v1048_v12 = vmul.f32 %v1047_v6, %v1886_v35 }
 0x111   : > { %v662_v19 = vpop.permute.xlu1 %661  ;;  %v652_v22 = vpop.permute.xlu0 %651  ;;  %v646_v34 = vadd.f32 %v644_v55, %v636_v14 }
 0x112   : > { %v663_v23 = vrot.slane %v662_v19, 7  ;;  %v653_v24 = vrot.slane %v652_v22, 7  ;;  %v967_v26 = vpop.permute.xlu2 %966 }
 0x113   : > { %904 = vrot.lane.b32.xlu1 %v902_v15, %s1713_s4  ;;  %v968_v29 = vrot.slane %v967_v26, 1 }
 0x114   : > { %v654_v11 = vsel %vm314_vm6, %v653_v24, %v652_v22  ;;  %v664_v32 = vsel %vm325_vm7, %v663_v23, %v662_v19  ;;  %v1057_v19 = vstv %s1448_s20  ;;  %v1028_v24 = vmul.f32 %v2208_v9, %v1027_v17 }
 0x115   : > { %v656_v31 = vadd.f32 %v654_v11, %v646_v34  ;;  %v969_v3 = vsel %vm280_vm3, %v967_v26, %v968_v29  ;;  %v1058_v26 = vmul.f32 %v1057_v19, %v1886_v35  ;;  %v1086_v11 = vstv %s1450_s22  ;;  %s1252_s22 = scalar_lea.hbm %s2384_s3, %s1466_s11 }
 0x116   : > { %v2175_v36 = vadd.f32 %v969_v3, %v961_v25 }
 0x117   : > { %v666_v37 = vadd.f32 %v664_v32, %v656_v31  ;;  %924 = vrot.lane.b32.xlu0 %v922_v28, %s1714_s23  ;;  %v911_v31 = vstv %s1433_s18  ;;  %v1193_v32 = vstv %s1462_s24  ;;  %s217_s24 = scalar_lea.vmem [#allocation10], %s1363_s10 }
 0x118   : > { %v912_v35 = vmul.f32 %v1556_v39, %v911_v31 }
 0x119   : > { %v694_v40 = vpop.permute.xlu1 %693  ;;  %668 = vrot.lane.b32.xlu2 %v666_v37, %s1719_s5  ;;  %v684_v43 = vpop.permute.xlu0 %683  ;;  %v1555_v37 = vld [vmem:[#allocation2] sm:$0x7]  ;;  %s1720_s5 = smov 47  }
 0x11a   : > { %v695_v45 = vrot.slane %v694_v40, 1  ;;  %v685_v47 = vrot.slane %v684_v43, 1  ;;  %v2192_v54 = vpop.permute.xlu2 %850 }
 0x11b   : > { %789 = vrot.lane.b32.xlu1 %v787_v38, %s1714_s23  ;;  %v1087_v38 = vmul.f32 %v1555_v37, %v1086_v11 }
 0x11c   : > { %v696_v52 = vsel %vm280_vm3, %v694_v40, %v695_v45  ;;  %v686_v58 = vsel %vm269_vm2, %v684_v43, %v685_v47 }
 0x11d   : > { %v688_v42 = vadd.f32 %v686_v58, %v678_v41  ;;  %v1194_v41 = vmul.f32 %v1556_v39, %v1193_v32 }
 0x11f   : > { %v698_v20 = vadd.f32 %v696_v52, %v688_v42  ;;  %934 = vrot.lane.b32.xlu0 %v932_v51, %s1716_s21  ;;  %v852_v42 = vrot.slane %v2192_v54, 7 }
 0x121   : > { %v831_v63 = vpop.permute.xlu1 %830  ;;  %1142 = vrot.lane.b32.xlu2 %v1140_v57, %s1716_s21  ;;  %v821_v49 = vpop.permute.xlu0 %820  ;;  %v709_v1 = vadd.f32 %v707_v59, %v698_v20 }
 0x122   : > { %v832_v2 = vrot.slane %v831_v63, 1  ;;  %v822_v4 = vrot.slane %v821_v49, 1  ;;  %v2211_v46 = vpop.permute.xlu2 %734 }
 0x123   : > { %1166 = vrot.lane.b32.xlu1 %v1164_v61, %s1711_s26 }
 0x124   : > { %v833_v16 = vsel %vm280_vm3, %v831_v63, %v832_v2  ;;  %v823_v5 = vsel %vm269_vm2, %v821_v49, %v822_v4  ;;  %v853_v49 = vsel %vm303_vm5, %v852_v42, %v2192_v54 }
 0x125   : > { %v825_v7 = vadd.f32 %v823_v5, %v815_v0 }
 0x127   : > { %v835_v56 = vadd.f32 %v833_v16, %v825_v7  ;;  %1070 = vrot.lane.b32.xlu0 %v1068_v48, %s1716_s21 }
 0x129   : > { %v841_v8 = vpop.permute.xlu1 %840  ;;  %1020 = vrot.lane.b32.xlu2 %v1018_v21, %s1712_s27  ;;  %v715_v13 = vpop.permute.xlu0 %714  ;;  %s1421_s27 = sld [smem:[#allocation3 + $0x5e]] }
 0x12a   : > { %v842_v14 = vrot.slane %v841_v8, 7  ;;  %v716_v15 = vrot.slane %v715_v13, 7  ;;  %v1113_v25 = vpop.permute.xlu2 %1112 }
 0x12b   : > { %1050 = vrot.lane.b32.xlu1 %v1048_v12, %s1715_s17  ;;  %v1114_v43 = vrot.slane %v1113_v25, 7  ;;  %v1183_v12 = vstv %s1461_s25 }
 0x12c   : > { %v843_v55 = vsel %vm291_vm4, %v842_v14, %v841_v8  ;;  %v717_v18 = vsel %vm303_vm5, %v716_v15, %v715_v13  ;;  %v1184_v8 = vmul.f32 %v1556_v39, %v1183_v12  ;;  %v1203_v14 = vstv %s1463_s28 }
 0x12d   : > { %v845_v22 = vadd.f32 %v843_v55, %v835_v56  ;;  %v719_v23 = vadd.f32 %v717_v18, %v709_v1  ;;  %v1115_v60 = vsel %vm291_vm4, %v1114_v43, %v1113_v25  ;;  %v1204_v15 = vmul.f32 %v1556_v39, %v1203_v14  ;;  %v245_v25 = vld [vmem:[#allocation7] ss:$8 sm:$0x3] }
 0x12f   : > { %v796_v58 = vstv %s1421_s27  ;;  %v855_v5 = vadd.f32 %v853_v49, %v845_v22  ;;  %s1254_s27 = sshll.u32 %s217_s24, 4  ;;  %s1255_s27 = int_to_ptr.vmem [resolvable:$true] %s1254_s27 }
 0x130   : > { %v797_v62 = vmul.f32 %v1556_v39, %v796_v58 }
 0x131   : > { %v725_v34 = vpop.permute.xlu1 %724  ;;  %1030 = vrot.lane.b32.xlu2 %v1028_v24, %s1711_s26  ;;  %v1093_v28 = vpop.permute.xlu0 %1092  ;;  %s1460_s26 = sld [smem:[#allocation3 + $0x4c]] }
 0x132   : > { %v726_v29 = vrot.slane %v725_v34, 7  ;;  %v1094_v30 = vrot.slane %v1093_v28, 1  ;;  %v1123_v44 = vpop.permute.xlu2 %1122 }
 0x133   : > { %1060 = vrot.lane.b32.xlu1 %v1058_v26, %s1714_s23  ;;  %v1124_v53 = vrot.slane %v1123_v44, 7 }
 0x134   : > { %v727_v3 = vsel %vm314_vm6, %v726_v29, %v725_v34  ;;  %v1095_v40 = vsel %vm269_vm2, %v1093_v28, %v1094_v30  ;;  %v247_v28 = vld [vmem:[#allocation7 + $0x1] ss:$8 sm:$0x3] }
 0x135   : > { %v2224_v33 = vadd.f32 %v727_v3, %v719_v23  ;;  %v1097_v45 = vadd.f32 %v1095_v40, %v1087_v38  ;;  %v1125_v63 = vsel %vm303_vm5, %v1124_v53, %v1123_v44  ;;  %v249_v38 = vld [vmem:[#allocation7 + $0x2] ss:$8 sm:$0x3]  ;;  %v736_v53 = vrot.slane %v2211_v46, 7 }
 0x137   : > { %v1173_v16 = vstv %s1460_s26  ;;  %s1256_s26 = sshll.u32 %s1252_s22, 4  ;;  %s1257_s26 = int_to_ptr.hbm [resolvable:$true] %s1256_s26 }
 0x138   : > { %v1174_v56 = vmul.f32 %v1556_v39, %v1173_v16  ;;  %s1646_s25 = sshra.s32 %s1257_s26, 4  ;;  %s1647_s25 = int_to_ptr.hbm [resolvable:$true] %s1646_s25 }
 0x139   : > { %v1103_v47 = vpop.permute.xlu1 %1102  ;;  %914 = vrot.lane.b32.xlu2 %v912_v35, %s1715_s17  ;;  %v977_v50 = vpop.permute.xlu0 %976  ;;  %s1648_s28 = scalar_lea.hbm %s1647_s25, 2  ;;  %p1653_p9 = scmp.lt.s32.totalorder %s1647_s25, %s2384_s3 }
 0x13a   : > { %v1104_v51 = vrot.slane %v1103_v47, 1  ;;  %v978_v52 = vrot.slane %v977_v50, 7  ;;  %v2257_v24 = vpop.permute.xlu2 %1132  ;;  %p1649_p1 = scmp.ne.s32.totalorder %s1647_s25, %s1648_s28 }
 0x13b   : > { %1196 = vrot.lane.b32.xlu1 %v1194_v41, %s1714_s23 }
 0x13c   : > { %v1105_v57 = vsel %vm280_vm3, %v1103_v47, %v1104_v51  ;;  %v979_v59 = vsel %vm291_vm4, %v978_v52, %v977_v50  ;;  %p1650_p4 = pnand %p1649_p1, %p1809_p3 }
 0x13d   : > { %v1107_v20 = vadd.f32 %v1105_v57, %v1097_v45  ;;  %v981_v61 = vadd.f32 %v979_v59, %v2175_v36 }
 0x13e   : > { %p1651_p8 = pneg %p1650_p4 }
 0x13f   : > { %v1117_v0 = vadd.f32 %v1115_v60, %v1107_v20 }
 0x141   : > { %v987_v1 = vpop.permute.xlu1 %986  ;;  %799 = vrot.lane.b32.xlu2 %v797_v62, %s1716_s21  ;;  %v861_v2 = vpop.permute.xlu0 %860  ;;  %v2238_v4 = vadd.f32 %v1125_v63, %v1117_v0  ;;  %v737_v63 = vsel %vm325_vm7, %v736_v53, %v2211_v46 }
 0x142   : > { %v988_v27 = vrot.slane %v987_v1, 7  ;;  %v862_v48 = vrot.slane %v861_v2, 7  ;;  %v739_v16 = vadd.f32 %v737_v63, %v2224_v33 }
 0x144   : > { %v989_v36 = vsel %vm303_vm5, %v988_v27, %v987_v1  ;;  %v863_v6 = vsel %vm314_vm6, %v862_v48, %v861_v2 }
 0x145   : > { %v2242_v7 = vadd.f32 %v989_v36, %v981_v61  ;;  %v865_v21 = vadd.f32 %v863_v6, %v855_v5 }
 0x149   : > { %1176 = vrot.lane.b32.xlu2 %v1174_v56, %s1713_s4  ;;  %v871_v54 = vpop.permute.xlu0 %870  ;;  %v2249_v55 = vpop.permute.xlu1 %996  ;;  %s1429_s4 = sld [smem:[#allocation3 + $0x35]] }
 0x14a   : > { %v872_v52 = vrot.slane %v871_v54, 7  ;;  %v998_v5 = vrot.slane %v2249_v55, 7 }
 0x14c   : > { %v873_v42 = vsel %vm325_vm7, %v872_v52, %v871_v54 }
 0x14d   : > { %v875_v20 = vadd.f32 %v873_v42, %v865_v21 }
 0x14f   : > { %v877_v57 = vstv %s1429_s4 }
 0x150   : > { %v878_v61 = vmul.f32 %v2208_v9, %v877_v57  ;;  %v1134_v57 = vrot.slane %v2257_v24, 7 }
 0x151   : > { %1186 = vrot.lane.b32.xlu2 %v1184_v8, %s1715_s17  ;;  %v2246_v13 = vpop.permute.xlu0 %748  ;;  %v2253_v19 = vpop.permute.xlu1 %1006  ;;  %s1415_s17 = sld [smem:[#allocation3 + $0x34]] }
 0x152   : > { %v750_v2 = vrot.slane %v2246_v13, 1  ;;  %v879_v6 = vadd.f32 %v878_v61, %v875_v20  ;;  %v1008_v56 = vrot.slane %v2253_v19, 7 }
 0x154   : > { %v751_v8 = vsel %vm269_vm2, %v2246_v13, %v750_v2  ;;  %v1009_v13 = vsel %vm325_vm7, %v1008_v56, %v2253_v19 }
 0x157   : > { %v741_v0 = vstv %s1415_s17 }
 0x158   : > { %v742_v36 = vmul.f32 %v2208_v9, %v741_v0 }
 0x159   : > { %1206 = vrot.lane.b32.xlu2 %v1204_v15, %s1716_s21  ;;  %v397_v17 = vpop.permute.xlu0 %396  ;;  %s2278_s21 = sld [smem:[#allocation3 + $0x36]] }
 0x15a   : > { %v398_v23 = vrot.slane %v397_v17, 1 }
 0x15c   : > { %v400_v34 = vsel %vm399_vm8, %v397_v17, %v398_v23  ;;  %v999_v17 = vsel %vm314_vm6, %v998_v5, %v2249_v55  ;;  %v743_v23 = vadd.f32 %v742_v36, %v739_v16 }
 0x15d   : > { %v402_v30 = vmul.f32 %v400_v34, %v245_v25 }
 0x161   : > { %v2251_v18 = vpop.permute.xlu0 %758 }
 0x162   : > { %v760_v21 = vrot.slane %v2251_v18, 1 }
 0x164   : > { %v761_v34 = vsel %vm280_vm3, %v2251_v18, %v760_v21  ;;  %v1001_v18 = vadd.f32 %v999_v17, %v2242_v7  ;;  %v1149_v21 = vstv %s2307_s29 }
 0x169   : > { %v2255_v22 = vpop.permute.xlu0 %769 }
 0x16a   : > { %v771_v14 = vrot.slane %v2255_v22, 7 }
 0x16c   : > { %v772_v55 = vsel %vm291_vm4, %v771_v14, %v2255_v22 }
 0x16d   : > { %v533_v26 = vpop.permute.xlu1 %532 }
 0x16e   : > { %v534_v29 = vrot.slane %v533_v26, 1 }
 0x170   : > { %v536_v11 = vsel %vm535_vm9, %v533_v26, %v534_v29 }
 0x171   : > { %v538_v31 = vmul.f32 %v536_v11, %v247_v28  ;;  %v2259_v3 = vpop.permute.xlu0 %779 }
 0x172   : > { %v781_v28 = vrot.slane %v2259_v3, 7 }
 0x173   : > { %v539_v32 = vadd.f32 %v538_v31, %v402_v30  ;;  %v669_v37 = vpop.permute.xlu2 %668  ;;  %v753_v30 = vadd.f32 %v751_v8, %v743_v23  ;;  %v1013_v31 = vstv %s2278_s21  ;;  %s1652_s21 = scalar_lea.hbm %s2384_s3, 4 }
 0x174   : > { %v670_v39 = vrot.slane %v669_v37, 1  ;;  %v1014_v53 = vmul.f32 %v2208_v9, %v1013_v31  ;;  %p1654_p2 = scmp.lt.s32.totalorder %s1652_s21, %s1648_s28 }
 0x175   : > { %v885_v35 = vpop.permute.xlu1 %884 }
 0x176   : > { %v672_v40 = vsel %vm671_vm10, %v669_v37, %v670_v39  ;;  %v886_v60 = vrot.slane %v885_v35, 1  ;;  %p1655_p10 = por %p1654_p2, %p1653_p9 }
 0x177   : > { %v674_v41 = vmul.f32 %v672_v40, %v249_v38  ;;  %v763_v40 = vadd.f32 %v761_v34, %v753_v30 }
 0x178   : > { %v887_v27 = vsel %vm269_vm2, %v885_v35, %v886_v60  ;;  %p1656_p11 = pnand %p1655_p10, %p1651_p8 }
 0x179   : > { %v2261_v43 = vadd.f32 %v674_v41, %v539_v32  ;;  %v2263_v44 = vpop.permute.xlu0 %1156  ;;  %v889_v54 = vadd.f32 %v887_v27, %v879_v6  ;;  %v774_v22 = vadd.f32 %v772_v55, %v763_v40 }
 0x17b   : > { %v2265_v45 = vpop.permute.xlu2 %1142 }
 0x17c   : > { %v1144_v61 = vrot.slane %v2265_v45, 7 }
 0x17d   : > { %v895_v47 = vpop.permute.xlu1 %894 }
 0x17e   : > { %v896_v49 = vrot.slane %v895_v47, 1 }
 0x180   : > { %v897_v46 = vsel %vm280_vm3, %v895_v47, %v896_v49  ;;  %v782_v47 = vsel %vm303_vm5, %v781_v28, %v2259_v3 }
 0x181   : > { %v2267_v50 = vpop.permute.xlu0 %1040  ;;  %v899_v25 = vadd.f32 %v897_v46, %v889_v54  ;;  %v784_v60 = vadd.f32 %v782_v47, %v774_v22 }
 0x183   : > { %v2269_v51 = vpop.permute.xlu2 %1020 }
 0x184   : > { %v1022_v19 = vrot.slane %v2269_v51, 1 }
 0x185   : > { %v905_v58 = vpop.permute.xlu1 %904 }
 0x186   : > { %v906_v48 = vrot.slane %v905_v58, 7  ;;  %v1023_v63 = vsel %vm269_vm2, %v2269_v51, %v1022_v19  ;;  %v1145_v51 = vsel %vm325_vm7, %v1144_v61, %v2265_v45 }
 0x188   : > { %v907_v33 = vsel %vm291_vm4, %v906_v48, %v905_v58  ;;  %v1011_v58 = vadd.f32 %v1009_v13, %v1001_v18  ;;  %v1135_v48 = vsel %vm314_vm6, %v1134_v57, %v2257_v24 }
 0x189   : > { %v925_v59 = vpop.permute.xlu0 %924  ;;  %v909_v32 = vadd.f32 %v907_v33, %v899_v25  ;;  %v1137_v56 = vadd.f32 %v1135_v48, %v2238_v4  ;;  %v1158_v33 = vrot.slane %v2263_v44, 1 }
 0x18a   : > { %v926_v15 = vrot.slane %v925_v59, 7  ;;  %v1015_v49 = vadd.f32 %v1014_v53, %v1011_v58 }
 0x18b   : > { %v2274_v62 = vpop.permute.xlu2 %1030  ;;  %v1147_v8 = vadd.f32 %v1145_v51, %v1137_v56  ;;  %v1159_v28 = vsel %vm269_vm2, %v2263_v44, %v1158_v33 }
 0x18c   : > { %v927_v39 = vsel %vm314_vm6, %v926_v15, %v925_v59  ;;  %v1032_v7 = vrot.slane %v2274_v62, 1  ;;  %v1025_v36 = vadd.f32 %v1023_v63, %v1015_v49  ;;  %v253_v63 = vld [vmem:[#allocation7 + $0x4] ss:$8 sm:$0x3] }
 0x18d   : > { %v790_v1 = vpop.permute.xlu1 %789 }
 0x18e   : > { %v791_v38 = vrot.slane %v790_v1, 7  ;;  %v1033_v16 = vsel %vm280_vm3, %v2274_v62, %v1032_v7  ;;  %v1150_v62 = vmul.f32 %v2208_v9, %v1149_v21  ;;  %v251_v7 = vld [vmem:[#allocation7 + $0x3] ss:$8 sm:$0x3] }
 0x18f   : > { %v1035_v54 = vadd.f32 %v1033_v16, %v1025_v36 }
 0x190   : > { %v792_v59 = vsel %vm314_vm6, %v791_v38, %v790_v1  ;;  %v1042_v1 = vrot.slane %v2267_v50, 7 }
 0x191   : > { %v935_v12 = vpop.permute.xlu0 %934  ;;  %v794_v2 = vadd.f32 %v792_v59, %v784_v60 }
 0x192   : > { %v936_v11 = vrot.slane %v935_v12, 7 }
 0x193   : > { %v915_v26 = vpop.permute.xlu2 %914 }
 0x194   : > { %v916_v29 = vrot.slane %v915_v26, 7  ;;  %v937_v52 = vsel %vm325_vm7, %v936_v11, %v935_v12  ;;  %v1043_v12 = vsel %vm291_vm4, %v1042_v1, %v2267_v50 }
 0x195   : > { %v1167_v37 = vpop.permute.xlu1 %1166  ;;  %v1045_v17 = vadd.f32 %v1043_v12, %v1035_v54 }
 0x196   : > { %v917_v35 = vsel %vm303_vm5, %v916_v29, %v915_v26  ;;  %v1168_v25 = vrot.slane %v1167_v37, 1  ;;  %v1151_v26 = vadd.f32 %v1150_v62, %v1147_v8 }
 0x197   : > { %v919_v41 = vadd.f32 %v917_v35, %v909_v32 }
 0x198   : > { %v1169_v13 = vsel %vm280_vm3, %v1167_v37, %v1168_v25  ;;  %v1161_v30 = vadd.f32 %v1159_v28, %v1151_v26 }
 0x199   : > { %v929_v42 = vadd.f32 %v927_v39, %v919_v41  ;;  %v1071_v24 = vpop.permute.xlu0 %1070 }
 0x19a   : > { %v1072_v45 = vrot.slane %v1071_v24, 7  ;;  %v1171_v39 = vadd.f32 %v1169_v13, %v1161_v30 }
 0x19b   : > { %v939_v20 = vadd.f32 %v937_v52, %v929_v42  ;;  %v800_v3 = vpop.permute.xlu2 %799 }
 0x19c   : > { %v801_v0 = vrot.slane %v800_v3, 7  ;;  %v1073_v9 = vsel %vm325_vm7, %v1072_v45, %v1071_v24 }
 0x19d   : > { %v1051_v27 = vpop.permute.xlu1 %1050  ;;  %941 = vrot.lane.b32.xlu1 %v939_v20, %s1720_s5 }
 0x19e   : > { %v802_v5 = vsel %vm325_vm7, %v801_v0, %v800_v3  ;;  %v1052_v46 = vrot.slane %v1051_v27, 7 }
 0x19f   : > { %v804_v6 = vadd.f32 %v802_v5, %v794_v2  ;;  %v257_v5 = vld [vmem:[#allocation7 + $0x6] ss:$8 sm:$0x3] }
 0x1a0   : > { %v1053_v15 = vsel %vm303_vm5, %v1052_v46, %v1051_v27  ;;  %v255_v27 = vld [vmem:[#allocation7 + $0x5] ss:$8 sm:$0x3] }
 0x1a1   : > { %806 = vrot.lane.b32.xlu0 %v804_v6, %s1714_s23  ;;  %v1055_v34 = vadd.f32 %v1053_v15, %v1045_v17  ;;  %s1721_s23 = smov 46  }
 0x1a3   : > { %v1177_v14 = vpop.permute.xlu2 %1176 }
 0x1a4   : > { %v1178_v29 = vrot.slane %v1177_v14, 7 }
 0x1a5   : > { %v1061_v23 = vpop.permute.xlu1 %1060 }
 0x1a6   : > { %v1062_v4 = vrot.slane %v1061_v23, 7  ;;  %v1179_v55 = vsel %vm291_vm4, %v1178_v29, %v1177_v14 }
 0x1a7   : > { %v1181_v40 = vadd.f32 %v1179_v55, %v1171_v39 }
 0x1a8   : > { %v1063_v50 = vsel %vm314_vm6, %v1062_v4, %v1061_v23 }
 0x1a9   : > { %v1065_v11 = vadd.f32 %v1063_v50, %v1055_v34 }
 0x1ab   : > { %v1075_v31 = vadd.f32 %v1073_v9, %v1065_v11  ;;  %v1187_v32 = vpop.permute.xlu2 %1186 }
 0x1ac   : > { %v1188_v38 = vrot.slane %v1187_v32, 7 }
 0x1ad   : > { %v1197_v35 = vpop.permute.xlu1 %1196  ;;  %1077 = vrot.lane.b32.xlu2 %v1075_v31, %s1721_s23 }
 0x1ae   : > { %v1189_v44 = vsel %vm303_vm5, %v1188_v38, %v1187_v32  ;;  %v1198_v18 = vrot.slane %v1197_v35, 7 }
 0x1af   : > { %v1191_v41 = vadd.f32 %v1189_v44, %v1181_v40 }
 0x1b0   : > { %v1199_v47 = vsel %vm314_vm6, %v1198_v18, %v1197_v35 }
 0x1b1   : > { %v1201_v37 = vadd.f32 %v1199_v47, %v1191_v41 }
 0x1b3   : > { %v1207_v19 = vpop.permute.xlu2 %1206 }
 0x1b4   : > { %v1208_v52 = vrot.slane %v1207_v19, 7 }
 0x1b6   : > { %v1209_v58 = vsel %vm325_vm7, %v1208_v52, %v1207_v19 }
 0x1b7   : > { %v1211_v22 = vadd.f32 %v1209_v58, %v1201_v37 }
 0x1b9   : > { %1213 = vrot.lane.b32.xlu0 %v1211_v22, %s1722_s9 }
 0x207   : > { %v1078_v20 = vpop.permute.xlu2 %1077 }
 0x208   : > { %v1079_v61 = vrot.slane %v1078_v20, 1 }
 0x20a   : > { %v1081_v48 = vsel %vm1080_vm12, %v1078_v20, %v1079_v61 }
 0x20b   : > { %v1083_v6 = vmul.f32 %v1081_v48, %v255_v27 }
 0x20f   : > { %v942_v57 = vpop.permute.xlu1 %941 }
 0x210   : > { %v943_v60 = vrot.slane %v942_v57, 1 }
 0x212   : > { %v945_v0 = vsel %vm944_vm11, %v942_v57, %v943_v60 }
 0x213   : > { %v807_v53 = vpop.permute.xlu0 %806  ;;  %v947_v2 = vmul.f32 %v945_v0, %v253_v63 }
 0x214   : > { %v808_v42 = vrot.slane %v807_v53, 1 }
 0x216   : > { %v809_v59 = vsel %vm314_vm6, %v807_v53, %v808_v42 }
 0x217   : > { %v811_v3 = vmul.f32 %v809_v59, %v251_v7 }
 0x219   : > { %v812_v49 = vadd.f32 %v811_v3, %v2261_v43 }
 0x21b   : > { %v948_v1 = vadd.f32 %v947_v2, %v812_v49 }
 0x21d   : > { %v1084_v21 = vadd.f32 %v1083_v6, %v948_v1 }
 0x22b   : > { %v1214_v16 = vpop.permute.xlu0 %1213 }
 0x22c   : > { %v1215_v36 = vrot.slane %v1214_v16, 1 }
 0x22e   : > { %v1217_v51 = vsel %vm1216_vm13, %v1214_v16, %v1215_v36 }
 0x22f   : > { %v1219_v46 = vmul.f32 %v1217_v51, %v257_v5 }
 0x231   : > { %v1220_v56 = vadd.f32 %v1219_v46, %v1084_v21 }
 0x233   : > { %v1464_v54 = vmul.f32 -1.442695, %v1220_v56 }
 0x235   : > { %1550 = vpow2.f32 %v1464_v54 }
 0x23b   : > { %v1551_v24 = vpop.eup %1550 }
 0x23c   : > { %v1224_v12 = vadd.f32 1.0, %v1551_v24 }
 0x23e   : > { %1552 = vrcp.f32 %v1224_v12  ;;  %v1236_v14 = vand.u32 2147483648, %v1224_v12  ;;  %v1234_v15 = vand.u32 2147483647, %v1224_v12  ;;  %vm1230_vm15 = vweird.f32 %v1224_v12 }
 0x240   : > { %v1237_v17 = vor.u32 1.1754944e-38, %v1236_v14  ;;  %vm1235_vm2 = vcmp.eq.f32.partialorder %v1234_v15, 8.507059e+37 }
 0x244   : > { %v1553_v43 = vpop.eup %1552 }
 0x245   : > { %v1226_v8 = vmul.f32 %v1553_v43, %v1224_v12  ;;  %vm1231_vm14 = vweird.f32 %v1553_v43 }
 0x246   : > { %vm1232_vm0 = vmor %vm1230_vm15, %vm1231_vm14 }
 0x247   : > { %v1227_v62 = vsub.f32 1.0, %v1226_v8 }
 0x249   : > { %v1228_v33 = vmul.f32 %v1553_v43, %v1227_v62 }
 0x24b   : > { %v1229_v45 = vadd.f32 %v1553_v43, %v1228_v33 }
 0x24d   : > { %v1233_v23 = vsel %vm1232_vm0, %v1553_v43, %v1229_v45 }
 0x24e   : > { %v1238_v25 = vsel %vm1235_vm2, %v1237_v17, %v1233_v23 }
 0x24f   : > { %1240 = vst.msk [vmem:[%s217_s24] sm:$0x3] %vm1855_vm1, %v1238_v25 }
 0x250   : > { %1659 = shalt.err (!%p1656_p11)
}
 0x251   : > { %1480 = dma.vmem_to_hbm [thread:$0]  (%p1809_p3), %s1255_s27, 32, %s1257_s26, %s1242_s16  }
 0x252 PF: > { %s1268_s8 = sand.u32 1, %s1694_s12   ;;  %p2392_p12 = scmp.ge.s32.totalorder %s1706_s15, 2 }
 0x253   : > { %s1269_s23 = scalar_lea.sflag [#allocation5], %s1268_s8 }
 0x254   : > { %p1494_p13 = pnand %p2392_p12, %p1778_p6 }
 0x256   : > { %p1495_p0 = pneg %p1494_p13 }
 0x258   : > { %1689 = dma.done.wait (%p1495_p0), %s1269_s23, 32  }
 0x259   : > { %1691 = vsyncadd (%p1495_p0), %s1269_s23, 4294967264  ;;  %p18_p5 = scmp.ge.s32.totalorder %s1799_s30, 4   ;;  %s2393_s12 = smov %s1698_s13 }
 0x25a   : > { %s2394_s13 = smov %s1702_s14  ;;  %s2395_s14 = smov %s1815_s7 }
 0x25b   : > { %s2396_s15 = smov %s1799_s30  ;;  %20 = sbr.rel (!%p18_p5) target bundleno = 7 (0x7), region = 97 }
 0x260   :  { %1275 = vsyncpa [#allocation4], 1 }
 0x261   :  { %1277 = vsyncpa [#allocation4 + $0x1], 1 }
 0x262   :  { %1278 = vsyncpa [#allocation9], 1 }
 0x263   :  { %1280 = vsyncpa [#allocation9 + $0x1], 1 }
 0x264   :  { %1281 = vsyncpa [#allocation5], 1 }
 0x265   :  { %1283 = vsyncpa [#allocation5 + $0x1], 1 }
 0x266   :  { %1284 = vsyncpa [#allocation6], 1 }
 0x267   :  { %1286 = vsyncpa [#allocation6 + $0x1], 1 }

</bundles_post_ra>
